<compile_context>
chip_gen: v6e
topology: v6e:2x2x1
jax: 0.10.0
libtpu: 0.0.40
codegen_flags: <defaults>
</compile_context>

<pallas_src>
import functools

import jax
import jax.numpy as jnp
import numpy as np
from jax import lax
from jax.experimental import pallas as pl
from jax.experimental.pallas import tpu as pltpu


# ---------------------------------------------------------------------------
# Fused kernel: per-batch QKV proj + all-head attention + LayerNorm + out_proj.
# ---------------------------------------------------------------------------
def _fused_mha_kernel(x_ref, wqkv_ref, bqkv_ref, bias_ref,
                      ln_g_ref, ln_b_ref, wo_ref, bo_ref, o_ref,
                      *, num_heads, head_dim, eps):
    x = x_ref[0]                                                   # (N, C) f32
    C = num_heads * head_dim

    # Fused Q/K/V projection: one (N, C) @ (C, 3C) matmul.  Weights are
    # pre-transposed in the wrapper; softmax scaling is folded into the q slab;
    # the k bias segment is zeros (k_proj has no bias).
    qkv = jnp.dot(x, wqkv_ref[...], preferred_element_type=jnp.float32) + bqkv_ref[...]
    q = qkv[:, :C]
    k = qkv[:, C:2 * C]
    v = qkv[:, 2 * C:]

    # Per-head attention; results concatenated into a lane-dense (N, C) slab.
    outs = []
    for h in range(num_heads):                                     # static unroll
        lo = h * head_dim
        q_h = q[:, lo:lo + head_dim]                               # (N, hd)
        k_h = k[:, lo:lo + head_dim]
        v_h = v[:, lo:lo + head_dim]

        # scores: contract along head_dim without materializing k^T ("trans_b").
        s = lax.dot_general(q_h, k_h, (((1,), (1,)), ((), ())),
                            preferred_element_type=jnp.float32)    # (N, N)
        s = s + bias_ref[h]

        # numerically-stable softmax; the 1/denom is applied AFTER the PV matmul
        # so the elementwise scale touches (N, hd) instead of (N, N), and the
        # approx reciprocal runs on the (otherwise idle) EUP.
        m = jnp.max(s, axis=-1, keepdims=True)
        e = jnp.exp(s - m)                                         # unnormalized probs
        denom = jnp.sum(e, axis=-1, keepdims=True)
        o_h = jnp.dot(e.astype(v_h.dtype), v_h,
                      preferred_element_type=jnp.float32)          # (N, hd)
        outs.append(o_h * pl.reciprocal(denom, approx=True))

    o = jnp.concatenate(outs, axis=-1)                             # (N, C) merged heads

    # Fused LayerNorm(embed_dim) + output projection.
    mean = jnp.mean(o, axis=-1, keepdims=True)
    var = jnp.mean((o - mean) ** 2, axis=-1, keepdims=True)
    xn = (o - mean) * lax.rsqrt(var + eps)
    xn = xn * ln_g_ref[...] + ln_b_ref[...]
    y = jnp.dot(xn, wo_ref[...], preferred_element_type=jnp.float32) + bo_ref[...]
    o_ref[0] = y.astype(o_ref.dtype)


# ---------------------------------------------------------------------------
# Wrapper
# ---------------------------------------------------------------------------
def multihead_attention(query, attn_bias, params, *, num_heads):
    """query: (B, H, W, C); attn_bias: (B*num_heads, H*W, H*W)."""
    B, H, W, C = query.shape
    N = H * W
    hd = C // num_heads
    scaling = hd ** (-0.5)

    x = query.reshape(B, N, C)

    # One-time (trace-time) parameter transforms: transpose weights so the kernel
    # contracts along the last axis directly, fold the softmax scaling into q, and
    # fuse q/k/v weights+biases into a single (C, 3C) / (1, 3C) pair.
    wqkv = jnp.concatenate([(params["wq"] * scaling).T,
                            params["wk"].T,
                            params["wv"].T], axis=1)               # (C, 3C)
    bqkv = jnp.concatenate([params["bq"] * scaling,
                            jnp.zeros((C,), params["bv"].dtype),   # k_proj has no bias
                            params["bv"]]).reshape(1, 3 * C)
    wo_t = params["wo"].T
    bo = params["bo"].reshape(1, C)
    ln_g = params["ln_g"].reshape(1, C)
    ln_b = params["ln_b"].reshape(1, C)

    out = pl.pallas_call(
        functools.partial(_fused_mha_kernel,
                          num_heads=num_heads, head_dim=hd, eps=1e-5),
        out_shape=jax.ShapeDtypeStruct((B, N, C), query.dtype),
        grid_spec=pltpu.PrefetchScalarGridSpec(
            num_scalar_prefetch=0,
            grid=(B,),
            in_specs=[
                pl.BlockSpec((1, N, C), lambda b: (b, 0, 0)),               # x
                pl.BlockSpec((C, 3 * C), lambda b: (0, 0)),                 # [wq^T*s | wk^T | wv^T]
                pl.BlockSpec((1, 3 * C), lambda b: (0, 0)),                 # [bq*s | 0 | bv]
                pl.BlockSpec((num_heads, N, N), lambda b: (b, 0, 0)),       # attn_bias (this batch's heads)
                pl.BlockSpec((1, C), lambda b: (0, 0)),                     # ln gamma
                pl.BlockSpec((1, C), lambda b: (0, 0)),                     # ln beta
                pl.BlockSpec((C, C), lambda b: (0, 0)),                     # wo^T
                pl.BlockSpec((1, C), lambda b: (0, 0)),                     # bo
            ],
            out_specs=pl.BlockSpec((1, N, C), lambda b: (b, 0, 0)),
        ),
        compiler_params=pltpu.CompilerParams(dimension_semantics=("parallel",)),
    )(x, wqkv, bqkv, attn_bias, ln_g, ln_b, wo_t, bo)

    return out.reshape(B, H, W, C)


# ---------------------------------------------------------------------------
# Pure-JAX reference (mirrors the PyTorch forward) for correctness checking.
# ---------------------------------------------------------------------------
def reference(query, attn_bias, params, *, num_heads):
    B, H, W, C = query.shape
    N = H * W
    hd = C // num_heads
    scaling = hd ** (-0.5)
    x = query.reshape(B, N, C)

    def proj(w, b=None):
        y = jnp.einsum("bnc,oc->bno", x, w)
        if b is not None:
            y = y + b
        return y.reshape(B, N, num_heads, hd).transpose(0, 2, 1, 3).reshape(
            B * num_heads, N, hd)

    q = proj(params["wq"], params["bq"])
    k = proj(params["wk"])
    v = proj(params["wv"], params["bv"])
    attn = (q * scaling) @ jnp.swapaxes(k, -2, -1) + attn_bias
    attn = jax.nn.softmax(attn, axis=-1)
    o = (attn @ v).reshape(B, num_heads, N, hd).transpose(0, 2, 1, 3).reshape(B, N, C)
    mean = jnp.mean(o, axis=-1, keepdims=True)
    var = jnp.mean((o - mean) ** 2, axis=-1, keepdims=True)
    o = (o - mean) / jnp.sqrt(var + 1e-5) * params["ln_g"] + params["ln_b"]
    o = jnp.einsum("bnc,oc->bno", o, params["wo"]) + params["bo"]
    return o.reshape(B, H, W, C)


if __name__ == "__main__":
    B, H, W = 2, 8, 8
    embed_dim, num_heads = 32, 4
    N = H * W

    key = jax.random.PRNGKey(0)
    ks = jax.random.split(key, 12)
    scale = 0.05
    params = {
        "wq": scale * jax.random.normal(ks[0], (embed_dim, embed_dim), jnp.float32),
        "bq": scale * jax.random.normal(ks[1], (embed_dim,), jnp.float32),
        "wk": scale * jax.random.normal(ks[2], (embed_dim, embed_dim), jnp.float32),
        "wv": scale * jax.random.normal(ks[3], (embed_dim, embed_dim), jnp.float32),
        "bv": scale * jax.random.normal(ks[4], (embed_dim,), jnp.float32),
        "wo": scale * jax.random.normal(ks[5], (embed_dim, embed_dim), jnp.float32),
        "bo": scale * jax.random.normal(ks[6], (embed_dim,), jnp.float32),
        "ln_g": jnp.ones((embed_dim,), jnp.float32),
        "ln_b": jnp.zeros((embed_dim,), jnp.float32),
    }

    query = jax.random.normal(ks[7], (B, H, W, embed_dim), jnp.float32)
    attn_bias = 0.1 * jax.random.normal(ks[8], (B * num_heads, N, N), jnp.float32)

    out = multihead_attention(query, attn_bias, params, num_heads=num_heads)
    out = jax.block_until_ready(out)

    ref = reference(query, attn_bias, params, num_heads=num_heads)
    # Slightly loosened tolerance to accommodate the approx (EUP) reciprocal path.
    np.testing.assert_allclose(np.asarray(out), np.asarray(ref), rtol=2e-3, atol=2e-3)

    print("KERNEL_OK")
</pallas_src>

<mosaic_0001>
module attributes {stable_mosaic.version = 11 : i64} {
  func.func @_fused_mha_kernel(%arg0: i32, %arg1: memref<1x64x32xf32, #tpu.memory_space<vmem>>, %arg2: memref<32x96xf32, #tpu.memory_space<vmem>>, %arg3: memref<1x96xf32, #tpu.memory_space<vmem>>, %arg4: memref<4x64x64xf32, #tpu.memory_space<vmem>>, %arg5: memref<1x32xf32, #tpu.memory_space<vmem>>, %arg6: memref<1x32xf32, #tpu.memory_space<vmem>>, %arg7: memref<32x32xf32, #tpu.memory_space<vmem>>, %arg8: memref<1x32xf32, #tpu.memory_space<vmem>>, %arg9: memref<1x64x32xf32, #tpu.memory_space<vmem>>) attributes {dimension_semantics = [#tpu.dimension_semantics<parallel>], iteration_bounds = array<i64: 2>, scalar_prefetch = 0 : i64, scratch_operands = 0 : i64, tpu.core_type = #tpu.core_type<tc>, window_params = [{transform_indices = @transform_0, window_bounds = array<i64: 1, 64, 32>}, {pipeline_mode = #tpu.pipeline_mode<synchronous>, transform_indices = @transform_1, window_bounds = array<i64: 32, 96>}, {pipeline_mode = #tpu.pipeline_mode<synchronous>, transform_indices = @transform_2, window_bounds = array<i64: 1, 96>}, {transform_indices = @transform_3, window_bounds = array<i64: 4, 64, 64>}, {pipeline_mode = #tpu.pipeline_mode<synchronous>, transform_indices = @transform_4, window_bounds = array<i64: 1, 32>}, {pipeline_mode = #tpu.pipeline_mode<synchronous>, transform_indices = @transform_5, window_bounds = array<i64: 1, 32>}, {pipeline_mode = #tpu.pipeline_mode<synchronous>, transform_indices = @transform_6, window_bounds = array<i64: 32, 32>}, {pipeline_mode = #tpu.pipeline_mode<synchronous>, transform_indices = @transform_7, window_bounds = array<i64: 1, 32>}, {transform_indices = @transform_8, window_bounds = array<i64: 1, 64, 32>}]} {
    %c0 = arith.constant 0 : index
    %c0_0 = arith.constant 0 : index
    %c0_1 = arith.constant 0 : index
    %0 = vector.load %arg1[%c0, %c0_0, %c0_1] : memref<1x64x32xf32, #tpu.memory_space<vmem>>, vector<1x64x32xf32>
    %1 = vector.shape_cast %0 : vector<1x64x32xf32> to vector<64x32xf32>
    %c0_2 = arith.constant 0 : index
    %c0_3 = arith.constant 0 : index
    %2 = vector.load %arg2[%c0_2, %c0_3] : memref<32x96xf32, #tpu.memory_space<vmem>>, vector<32x96xf32>
    %cst = arith.constant dense<0.000000e+00> : vector<64x96xf32>
    %3 = tpu.matmul %1, %2, %cst {dimension_numbers = #tpu.dot_dimension_numbers<[1], [0], [0], [1], [0, 0, 1, 1], [], []>} : vector<64x32xf32>, vector<32x96xf32>, vector<64x96xf32> -> vector<64x96xf32>
    %c0_4 = arith.constant 0 : index
    %c0_5 = arith.constant 0 : index
    %4 = vector.load %arg3[%c0_4, %c0_5] : memref<1x96xf32, #tpu.memory_space<vmem>>, vector<1x96xf32>
    %5 = vector.broadcast %4 : vector<1x96xf32> to vector<64x96xf32>
    %6 = arith.addf %3, %5 : vector<64x96xf32>
    %7 = vector.extract_strided_slice %6 {offsets = [0, 0], sizes = [64, 32], strides = [1, 1]} : vector<64x96xf32> to vector<64x32xf32>
    %8 = vector.extract_strided_slice %6 {offsets = [0, 32], sizes = [64, 32], strides = [1, 1]} : vector<64x96xf32> to vector<64x32xf32>
    %9 = vector.extract_strided_slice %6 {offsets = [0, 64], sizes = [64, 32], strides = [1, 1]} : vector<64x96xf32> to vector<64x32xf32>
    %10 = vector.extract_strided_slice %7 {offsets = [0, 0], sizes = [64, 8], strides = [1, 1]} : vector<64x32xf32> to vector<64x8xf32>
    %11 = vector.extract_strided_slice %8 {offsets = [0, 0], sizes = [64, 8], strides = [1, 1]} : vector<64x32xf32> to vector<64x8xf32>
    %12 = vector.extract_strided_slice %9 {offsets = [0, 0], sizes = [64, 8], strides = [1, 1]} : vector<64x32xf32> to vector<64x8xf32>
    %cst_6 = arith.constant dense<0.000000e+00> : vector<64x64xf32>
    %13 = tpu.matmul %10, %11, %cst_6 {dimension_numbers = #tpu.dot_dimension_numbers<[1], [1], [0], [0], [0, 0, 1, 0], [], []>} : vector<64x8xf32>, vector<64x8xf32>, vector<64x64xf32> -> vector<64x64xf32>
    %c0_7 = arith.constant 0 : index
    %c0_8 = arith.constant 0 : index
    %c0_9 = arith.constant 0 : index
    %14 = vector.load %arg4[%c0_7, %c0_8, %c0_9] : memref<4x64x64xf32, #tpu.memory_space<vmem>>, vector<1x64x64xf32>
    %15 = vector.shape_cast %14 : vector<1x64x64xf32> to vector<64x64xf32>
    %16 = arith.addf %13, %15 : vector<64x64xf32>
    %cst_10 = arith.constant dense<0xFF800000> : vector<64xf32>
    %17 = vector.multi_reduction <maximumf>, %16, %cst_10 [1] : vector<64x64xf32> to vector<64xf32>
    %18 = vector.shape_cast %17 : vector<64xf32> to vector<64x1xf32>
    %19 = vector.broadcast %18 : vector<64x1xf32> to vector<64x64xf32>
    %20 = arith.subf %16, %19 : vector<64x64xf32>
    %21 = math.exp %20 : vector<64x64xf32>
    %cst_11 = arith.constant dense<0.000000e+00> : vector<64xf32>
    %22 = vector.multi_reduction <add>, %21, %cst_11 [1] : vector<64x64xf32> to vector<64xf32>
    %23 = vector.shape_cast %22 : vector<64xf32> to vector<64x1xf32>
    %cst_12 = arith.constant dense<0.000000e+00> : vector<64x8xf32>
    %24 = tpu.matmul %21, %12, %cst_12 {dimension_numbers = #tpu.dot_dimension_numbers<[1], [0], [0], [1], [0, 0, 1, 1], [], []>} : vector<64x64xf32>, vector<64x8xf32>, vector<64x8xf32> -> vector<64x8xf32>
    %25 = tpu.reciprocal %23 {approx = true} : vector<64x1xf32> -> vector<64x1xf32>
    %26 = vector.broadcast %25 : vector<64x1xf32> to vector<64x8xf32>
    %27 = arith.mulf %24, %26 : vector<64x8xf32>
    %28 = vector.extract_strided_slice %7 {offsets = [0, 8], sizes = [64, 8], strides = [1, 1]} : vector<64x32xf32> to vector<64x8xf32>
    %29 = vector.extract_strided_slice %8 {offsets = [0, 8], sizes = [64, 8], strides = [1, 1]} : vector<64x32xf32> to vector<64x8xf32>
    %30 = vector.extract_strided_slice %9 {offsets = [0, 8], sizes = [64, 8], strides = [1, 1]} : vector<64x32xf32> to vector<64x8xf32>
    %cst_13 = arith.constant dense<0.000000e+00> : vector<64x64xf32>
    %31 = tpu.matmul %28, %29, %cst_13 {dimension_numbers = #tpu.dot_dimension_numbers<[1], [1], [0], [0], [0, 0, 1, 0], [], []>} : vector<64x8xf32>, vector<64x8xf32>, vector<64x64xf32> -> vector<64x64xf32>
    %c1 = arith.constant 1 : index
    %c0_14 = arith.constant 0 : index
    %c0_15 = arith.constant 0 : index
    %32 = vector.load %arg4[%c1, %c0_14, %c0_15] : memref<4x64x64xf32, #tpu.memory_space<vmem>>, vector<1x64x64xf32>
    %33 = vector.shape_cast %32 : vector<1x64x64xf32> to vector<64x64xf32>
    %34 = arith.addf %31, %33 : vector<64x64xf32>
    %cst_16 = arith.constant dense<0xFF800000> : vector<64xf32>
    %35 = vector.multi_reduction <maximumf>, %34, %cst_16 [1] : vector<64x64xf32> to vector<64xf32>
    %36 = vector.shape_cast %35 : vector<64xf32> to vector<64x1xf32>
    %37 = vector.broadcast %36 : vector<64x1xf32> to vector<64x64xf32>
    %38 = arith.subf %34, %37 : vector<64x64xf32>
    %39 = math.exp %38 : vector<64x64xf32>
    %cst_17 = arith.constant dense<0.000000e+00> : vector<64xf32>
    %40 = vector.multi_reduction <add>, %39, %cst_17 [1] : vector<64x64xf32> to vector<64xf32>
    %41 = vector.shape_cast %40 : vector<64xf32> to vector<64x1xf32>
    %cst_18 = arith.constant dense<0.000000e+00> : vector<64x8xf32>
    %42 = tpu.matmul %39, %30, %cst_18 {dimension_numbers = #tpu.dot_dimension_numbers<[1], [0], [0], [1], [0, 0, 1, 1], [], []>} : vector<64x64xf32>, vector<64x8xf32>, vector<64x8xf32> -> vector<64x8xf32>
    %43 = tpu.reciprocal %41 {approx = true} : vector<64x1xf32> -> vector<64x1xf32>
    %44 = vector.broadcast %43 : vector<64x1xf32> to vector<64x8xf32>
    %45 = arith.mulf %42, %44 : vector<64x8xf32>
    %46 = vector.extract_strided_slice %7 {offsets = [0, 16], sizes = [64, 8], strides = [1, 1]} : vector<64x32xf32> to vector<64x8xf32>
    %47 = vector.extract_strided_slice %8 {offsets = [0, 16], sizes = [64, 8], strides = [1, 1]} : vector<64x32xf32> to vector<64x8xf32>
    %48 = vector.extract_strided_slice %9 {offsets = [0, 16], sizes = [64, 8], strides = [1, 1]} : vector<64x32xf32> to vector<64x8xf32>
    %cst_19 = arith.constant dense<0.000000e+00> : vector<64x64xf32>
    %49 = tpu.matmul %46, %47, %cst_19 {dimension_numbers = #tpu.dot_dimension_numbers<[1], [1], [0], [0], [0, 0, 1, 0], [], []>} : vector<64x8xf32>, vector<64x8xf32>, vector<64x64xf32> -> vector<64x64xf32>
    %c2 = arith.constant 2 : index
    %c0_20 = arith.constant 0 : index
    %c0_21 = arith.constant 0 : index
    %50 = vector.load %arg4[%c2, %c0_20, %c0_21] : memref<4x64x64xf32, #tpu.memory_space<vmem>>, vector<1x64x64xf32>
    %51 = vector.shape_cast %50 : vector<1x64x64xf32> to vector<64x64xf32>
    %52 = arith.addf %49, %51 : vector<64x64xf32>
    %cst_22 = arith.constant dense<0xFF800000> : vector<64xf32>
    %53 = vector.multi_reduction <maximumf>, %52, %cst_22 [1] : vector<64x64xf32> to vector<64xf32>
    %54 = vector.shape_cast %53 : vector<64xf32> to vector<64x1xf32>
    %55 = vector.broadcast %54 : vector<64x1xf32> to vector<64x64xf32>
    %56 = arith.subf %52, %55 : vector<64x64xf32>
    %57 = math.exp %56 : vector<64x64xf32>
    %cst_23 = arith.constant dense<0.000000e+00> : vector<64xf32>
    %58 = vector.multi_reduction <add>, %57, %cst_23 [1] : vector<64x64xf32> to vector<64xf32>
    %59 = vector.shape_cast %58 : vector<64xf32> to vector<64x1xf32>
    %cst_24 = arith.constant dense<0.000000e+00> : vector<64x8xf32>
    %60 = tpu.matmul %57, %48, %cst_24 {dimension_numbers = #tpu.dot_dimension_numbers<[1], [0], [0], [1], [0, 0, 1, 1], [], []>} : vector<64x64xf32>, vector<64x8xf32>, vector<64x8xf32> -> vector<64x8xf32>
    %61 = tpu.reciprocal %59 {approx = true} : vector<64x1xf32> -> vector<64x1xf32>
    %62 = vector.broadcast %61 : vector<64x1xf32> to vector<64x8xf32>
    %63 = arith.mulf %60, %62 : vector<64x8xf32>
    %64 = vector.extract_strided_slice %7 {offsets = [0, 24], sizes = [64, 8], strides = [1, 1]} : vector<64x32xf32> to vector<64x8xf32>
    %65 = vector.extract_strided_slice %8 {offsets = [0, 24], sizes = [64, 8], strides = [1, 1]} : vector<64x32xf32> to vector<64x8xf32>
    %66 = vector.extract_strided_slice %9 {offsets = [0, 24], sizes = [64, 8], strides = [1, 1]} : vector<64x32xf32> to vector<64x8xf32>
    %cst_25 = arith.constant dense<0.000000e+00> : vector<64x64xf32>
    %67 = tpu.matmul %64, %65, %cst_25 {dimension_numbers = #tpu.dot_dimension_numbers<[1], [1], [0], [0], [0, 0, 1, 0], [], []>} : vector<64x8xf32>, vector<64x8xf32>, vector<64x64xf32> -> vector<64x64xf32>
    %c3 = arith.constant 3 : index
    %c0_26 = arith.constant 0 : index
    %c0_27 = arith.constant 0 : index
    %68 = vector.load %arg4[%c3, %c0_26, %c0_27] : memref<4x64x64xf32, #tpu.memory_space<vmem>>, vector<1x64x64xf32>
    %69 = vector.shape_cast %68 : vector<1x64x64xf32> to vector<64x64xf32>
    %70 = arith.addf %67, %69 : vector<64x64xf32>
    %cst_28 = arith.constant dense<0xFF800000> : vector<64xf32>
    %71 = vector.multi_reduction <maximumf>, %70, %cst_28 [1] : vector<64x64xf32> to vector<64xf32>
    %72 = vector.shape_cast %71 : vector<64xf32> to vector<64x1xf32>
    %73 = vector.broadcast %72 : vector<64x1xf32> to vector<64x64xf32>
    %74 = arith.subf %70, %73 : vector<64x64xf32>
    %75 = math.exp %74 : vector<64x64xf32>
    %cst_29 = arith.constant dense<0.000000e+00> : vector<64xf32>
    %76 = vector.multi_reduction <add>, %75, %cst_29 [1] : vector<64x64xf32> to vector<64xf32>
    %77 = vector.shape_cast %76 : vector<64xf32> to vector<64x1xf32>
    %cst_30 = arith.constant dense<0.000000e+00> : vector<64x8xf32>
    %78 = tpu.matmul %75, %66, %cst_30 {dimension_numbers = #tpu.dot_dimension_numbers<[1], [0], [0], [1], [0, 0, 1, 1], [], []>} : vector<64x64xf32>, vector<64x8xf32>, vector<64x8xf32> -> vector<64x8xf32>
    %79 = tpu.reciprocal %77 {approx = true} : vector<64x1xf32> -> vector<64x1xf32>
    %80 = vector.broadcast %79 : vector<64x1xf32> to vector<64x8xf32>
    %81 = arith.mulf %78, %80 : vector<64x8xf32>
    %82 = tpu.concatenate %27, %45, %63, %81 in 1 : vector<64x8xf32>, vector<64x8xf32>, vector<64x8xf32>, vector<64x8xf32> -> vector<64x32xf32>
    %cst_31 = arith.constant dense<0.000000e+00> : vector<64xf32>
    %83 = vector.multi_reduction <add>, %82, %cst_31 [1] : vector<64x32xf32> to vector<64xf32>
    %84 = vector.shape_cast %83 : vector<64xf32> to vector<64x1xf32>
    %cst_32 = arith.constant 3.200000e+01 : f32
    %85 = vector.broadcast %cst_32 : f32 to vector<64x1xf32>
    %86 = arith.divf %84, %85 : vector<64x1xf32>
    %87 = vector.broadcast %86 : vector<64x1xf32> to vector<64x32xf32>
    %88 = arith.subf %82, %87 : vector<64x32xf32>
    %89 = arith.mulf %88, %88 : vector<64x32xf32>
    %cst_33 = arith.constant dense<0.000000e+00> : vector<64xf32>
    %90 = vector.multi_reduction <add>, %89, %cst_33 [1] : vector<64x32xf32> to vector<64xf32>
    %91 = vector.shape_cast %90 : vector<64xf32> to vector<64x1xf32>
    %cst_34 = arith.constant 3.200000e+01 : f32
    %92 = vector.broadcast %cst_34 : f32 to vector<64x1xf32>
    %93 = arith.divf %91, %92 : vector<64x1xf32>
    %94 = vector.broadcast %86 : vector<64x1xf32> to vector<64x32xf32>
    %95 = arith.subf %82, %94 : vector<64x32xf32>
    %cst_35 = arith.constant 9.99999974E-6 : f32
    %96 = vector.broadcast %cst_35 : f32 to vector<64x1xf32>
    %97 = arith.addf %93, %96 : vector<64x1xf32>
    %98 = math.rsqrt %97 : vector<64x1xf32>
    %99 = vector.broadcast %98 : vector<64x1xf32> to vector<64x32xf32>
    %100 = arith.mulf %95, %99 : vector<64x32xf32>
    %c0_36 = arith.constant 0 : index
    %c0_37 = arith.constant 0 : index
    %101 = vector.load %arg5[%c0_36, %c0_37] : memref<1x32xf32, #tpu.memory_space<vmem>>, vector<1x32xf32>
    %102 = vector.broadcast %101 : vector<1x32xf32> to vector<64x32xf32>
    %103 = arith.mulf %100, %102 : vector<64x32xf32>
    %c0_38 = arith.constant 0 : index
    %c0_39 = arith.constant 0 : index
    %104 = vector.load %arg6[%c0_38, %c0_39] : memref<1x32xf32, #tpu.memory_space<vmem>>, vector<1x32xf32>
    %105 = vector.broadcast %104 : vector<1x32xf32> to vector<64x32xf32>
    %106 = arith.addf %103, %105 : vector<64x32xf32>
    %c0_40 = arith.constant 0 : index
    %c0_41 = arith.constant 0 : index
    %107 = vector.load %arg7[%c0_40, %c0_41] : memref<32x32xf32, #tpu.memory_space<vmem>>, vector<32x32xf32>
    %cst_42 = arith.constant dense<0.000000e+00> : vector<64x32xf32>
    %108 = tpu.matmul %106, %107, %cst_42 {dimension_numbers = #tpu.dot_dimension_numbers<[1], [0], [0], [1], [0, 0, 1, 1], [], []>} : vector<64x32xf32>, vector<32x32xf32>, vector<64x32xf32> -> vector<64x32xf32>
    %c0_43 = arith.constant 0 : index
    %c0_44 = arith.constant 0 : index
    %109 = vector.load %arg8[%c0_43, %c0_44] : memref<1x32xf32, #tpu.memory_space<vmem>>, vector<1x32xf32>
    %110 = vector.broadcast %109 : vector<1x32xf32> to vector<64x32xf32>
    %111 = arith.addf %108, %110 : vector<64x32xf32>
    %c0_45 = arith.constant 0 : index
    %c0_46 = arith.constant 0 : index
    %c0_47 = arith.constant 0 : index
    %112 = vector.load %arg9[%c0_45, %c0_46, %c0_47] : memref<1x64x32xf32, #tpu.memory_space<vmem>>, vector<1x64x32xf32>
    %113 = vector.shape_cast %112 : vector<1x64x32xf32> to vector<64x32xf32>
    %114 = vector.shape_cast %111 : vector<64x32xf32> to vector<1x64x32xf32>
    tpu.vector_store %arg9[%c0_45, %c0_46, %c0_47], %114 {strides = array<i32>} : memref<1x64x32xf32, #tpu.memory_space<vmem>>, vector<1x64x32xf32>,
    return
  }
  func.func @transform_0(%arg0: i32) -> (i32, i32, i32) {
    %c0_i32 = arith.constant 0 : i32
    %c0_i32_0 = arith.constant 0 : i32
    %c0_i32_1 = arith.constant 0 : i32
    return %arg0, %c0_i32, %c0_i32_0 : i32, i32, i32
  }
  func.func @transform_1(%arg0: i32) -> (i32, i32) {
    %c0_i32 = arith.constant 0 : i32
    %c0_i32_0 = arith.constant 0 : i32
    %c0_i32_1 = arith.constant 0 : i32
    return %c0_i32, %c0_i32_0 : i32, i32
  }
  func.func @transform_2(%arg0: i32) -> (i32, i32) {
    %c0_i32 = arith.constant 0 : i32
    %c0_i32_0 = arith.constant 0 : i32
    %c0_i32_1 = arith.constant 0 : i32
    return %c0_i32, %c0_i32_0 : i32, i32
  }
  func.func @transform_3(%arg0: i32) -> (i32, i32, i32) {
    %c0_i32 = arith.constant 0 : i32
    %c0_i32_0 = arith.constant 0 : i32
    %c0_i32_1 = arith.constant 0 : i32
    return %arg0, %c0_i32, %c0_i32_0 : i32, i32, i32
  }
  func.func @transform_4(%arg0: i32) -> (i32, i32) {
    %c0_i32 = arith.constant 0 : i32
    %c0_i32_0 = arith.constant 0 : i32
    %c0_i32_1 = arith.constant 0 : i32
    return %c0_i32, %c0_i32_0 : i32, i32
  }
  func.func @transform_5(%arg0: i32) -> (i32, i32) {
    %c0_i32 = arith.constant 0 : i32
    %c0_i32_0 = arith.constant 0 : i32
    %c0_i32_1 = arith.constant 0 : i32
    return %c0_i32, %c0_i32_0 : i32, i32
  }
  func.func @transform_6(%arg0: i32) -> (i32, i32) {
    %c0_i32 = arith.constant 0 : i32
    %c0_i32_0 = arith.constant 0 : i32
    %c0_i32_1 = arith.constant 0 : i32
    return %c0_i32, %c0_i32_0 : i32, i32
  }
  func.func @transform_7(%arg0: i32) -> (i32, i32) {
    %c0_i32 = arith.constant 0 : i32
    %c0_i32_0 = arith.constant 0 : i32
    %c0_i32_1 = arith.constant 0 : i32
    return %c0_i32, %c0_i32_0 : i32, i32
  }
  func.func @transform_8(%arg0: i32) -> (i32, i32, i32) {
    %c0_i32 = arith.constant 0 : i32
    %c0_i32_0 = arith.constant 0 : i32
    %c0_i32_1 = arith.constant 0 : i32
    return %arg0, %c0_i32, %c0_i32_0 : i32, i32, i32
  }
}

</mosaic_0001>

<bundles_post_ra>
// kernel: tpu_custom_call.1
= control target key start
LH: loop header
LB: loop body
LE: loop exit
PB: predicated region body
PF: predicated region fallthrough
CT: control target
= control target key end

     0   :  { %13 = vsyncpa [#allocation3], 0  ;;  %s4516_s0 = inlined_call_operand.vmem [shape: f32[2,64,32], index: 0, kind: input, shape index: {}]   ;;  %s4517_s1 = inlined_call_operand.vmem [shape: f32[32,96], index: 1, kind: input, shape index: {}]   ;;  %s4518_s2 = inlined_call_operand.vmem [shape: f32[1,96], index: 2, kind: input, shape index: {}]   ;;  %s4519_s3 = inlined_call_operand.hbm [shape: f32[8,64,64], index: 3, kind: input, shape index: {}]   ;;  %s4520_s4 = inlined_call_operand.vmem [shape: f32[1,32], index: 4, kind: input, shape index: {}]   ;;  %s4521_s5 = inlined_call_operand.vmem [shape: f32[1,32], index: 5, kind: input, shape index: {}]   ;;  %s4522_s6 = inlined_call_operand.vmem [shape: f32[32,32], index: 6, kind: input, shape index: {}]   ;;  %s4523_s7 = inlined_call_operand.vmem [shape: f32[1,32], index: 7, kind: input, shape index: {}]   ;;  %s4524_s8 = inlined_call_operand.vmem [shape: f32[2,64,32], index: 8, kind: output, shape index: {}]  }
   0x1   :  { %15 = vsyncpa [#allocation3 + $0x1], 0  ;;  %s3566_s27 = smov 0   ;;  %s3568_s28 = smov 0  }
   0x2   :  { %s3570_s29 = smov 0   ;;  %s3572_s30 = smov 0  }
   0x3 LB: > { %s3585_s9 = sadd.s32 4294967295, %s3502_s30   ;;  %s3588_s10 = sadd.s32 1, %s3502_s30   ;;  %s3502_s30 = sphi %s3572_s30, %s4541_s30   ;;  %s3498_s29 = sphi %s3570_s29, %s4540_s29   ;;  %s3494_s28 = sphi %s3568_s28, %s4539_s28   ;;  %s3490_s27 = sphi %s3566_s27, %s4538_s27  }
   0x4   : > { %s93_s11 = ssub.s32 %s3502_s30, %s3588_s10  ;;  %s96_s12 = sadd.s32 1, %s3498_s29 }
   0x5   : > { %p94_p0 = scmp.eq.s32.totalorder %s93_s11, 0  ;;  %p103_p1 = scmp.ne.s32.totalorder %s3498_s29, %s3494_s28 }
   0x6   : > { %p104_p2 = scmp.eq.s32.totalorder %s3502_s30, 0  ;;  %p109_p3 = scmp.ne.s32.totalorder %s3494_s28, %s3490_s27 }
   0x7   : > { %s3598_s13 = scalar_select %p94_p0, %s3498_s29, %s96_s12  }
   0x8   : > { %p105_p4 = por %p104_p2, %p103_p1  ;;  %p110_p5 = scmp.eq.s32.totalorder %s3585_s9, 0 }
   0x9   : > { %p3247_p6 = scmp.lt.s32.totalorder %s3502_s30, 2  ;;  %s269_s15 = sand.u32 1, %s3498_s29  }
   0xa   : > { %p3602_p7 = por %p110_p5, %p109_p3  ;;  %s2653_s16 = sshll.u32 %s269_s15, 8 }
   0xb   : > { %s2806_s17 = sshll.u32 %s3502_s30, 12  ;;  %s273_s21 = scalar_lea.vmem [#allocation2], %s2653_s16 }
   0xc   : > { %s4526_s14 = scalar_select %p3602_p7, 1, 0 }
   0xd   : > { %s3611_s20 = scalar_lea.hbm %s4519_s3, %s2806_s17  ;;  %s281_s22 = sshll.u32 %s273_s21, 4  ;;  %s3613_s22 = int_to_ptr.vmem [resolvable:$true] %s281_s22 }
   0xe   : > { %p3615_p8 = pnand %p3247_p6, %p105_p4  ;;  %s3620_s24 = scalar_lea.sflag [#allocation3], %s269_s15 }
   0xf   : > { %s3440_s25 = scalar_lea.hbm %s3611_s20, 4096  ;;  %s3445_s11 = scalar_lea.hbm %s4519_s3, 8192 }
  0x10   : > { %p3441_p10 = scmp.ne.s32.totalorder %s3611_s20, %s3440_s25  ;;  %p3442_p11 = pneg %p3615_p8 }
  0x11   : > { %p3446_p0 = scmp.lt.s32.totalorder %s3611_s20, %s4519_s3  ;;  %p3447_p1 = scmp.lt.s32.totalorder %s3445_s11, %s3440_s25 }
  0x12   : > { %p3443_p12 = pnand %p3442_p11, %p3441_p10 }
  0x13   : > { %p3448_p2 = por %p3447_p1, %p3446_p0 }
  0x14   : > { %p3444_p13 = pneg %p3443_p12 }
  0x16   : > { %p3449_p3 = pnand %p3448_p2, %p3444_p13 }
  0x18   : > { %3452 = shalt.err (!%p3449_p3)
}
  0x19   : > { %s3453_s15 = scalar_lea.vmem %s3613_s22, 4096  ;;  %s3504_s17 = smov [#allocation2]  }
  0x1a   : > { %p3454_p4 = scmp.ne.s32.totalorder %s3613_s22, %s3453_s15  ;;  %s3458_s18 = sshll.u32 %s3504_s17, 4  ;;  %s3459_s18 = int_to_ptr.vmem [resolvable:$false] %s3458_s18 }
  0x1b   : > { %s3460_s19 = scalar_lea.vmem %s3459_s18, 8192  ;;  %p3461_p10 = scmp.lt.s32.totalorder %s3613_s22, %s3459_s18 }
  0x1c   : > { %p3456_p5 = pnand %p3454_p4, %p3442_p11  ;;  %p3462_p12 = scmp.lt.s32.totalorder %s3460_s19, %s3453_s15 }
  0x1e   : > { %p3457_p6 = pneg %p3456_p5  ;;  %p3463_p9 = por %p3462_p12, %p3461_p10 }
  0x20   : > { %p3464_p7 = pnand %p3463_p9, %p3457_p6 }
  0x22   : > { %3467 = shalt.err (!%p3464_p7)
}
  0x23   : > { %s3505_s21 = smov 128   ;;  %s3506_s25 = smov 8  }
  0x24   : > { %3246 = dma.hbm_to_vmem [thread:$0]  (!%p3615_p8), %s3611_s20, 4096, %s3613_s22, %s3620_s24, %s3505_s21, %s3505_s21, %s3506_s25  }
  0x25   : > { %p289_p11 = scmp.lt.s32.totalorder %s3502_s30, 3  ;;  %p4528_p13 = scmp.ge.s32.totalorder %s3502_s30, 1 }
  0x27   : > { %p290_p0 = pnand %p4528_p13, %p289_p11 }
  0x29   : > { %293 = sbr.rel (%p290_p0) target bundleno = 3010 (0xbc2), region = 52 }
  0x2e   : > { %s295_s26 = sand.u32 1, %s3494_s28   ;;  %p4529_p7 = scmp.ne.s32.totalorder %s4526_s14, 0 }
  0x2f   : > { %s2658_s27 = sshll.u32 %s295_s26, 8  ;;  %s296_s11 = scalar_lea.sflag [#allocation3], %s295_s26 }
  0x30   : > { %s3645_s12 = scalar_lea.vmem [#allocation2], %s2658_s27 }
  0x31   : > { %3485 = dma.done.wait (%p4529_p7), %s296_s11, 4096  }
  0x32   : > { %3487 = vsyncadd (%p4529_p7), %s296_s11, 4294963200  ;;  %p337_p9 = scmp.lt.s32.totalorder %s3585_s9, 1  ;;  %vm367_vm0 = vcmask 261120   ;;  %v359_v0 = vld [vmem:[%s4517_s1 + $0x18] sm:$0xff]  ;;  %v358_v1 = vld [vmem:[%s4517_s1 + $0x10] sm:$0xff]  ;;  %vm529_vm1 = vcmask 64512  }
  0x33   : > { %2961 = vmatprep.subr.mxu0 %v359_v0  ;;  %v357_v3 = vld [vmem:[%s4517_s1 + $0x8] sm:$0xff]  ;;  %v356_v4 = vld [vmem:[%s4517_s1] sm:$0xff]  ;;  %s3507_s27 = smov 96   ;;  %s3508_s11 = smov 64   ;;  %vm667_vm2 = vcmask 523264   ;;  %v499_v57 = vld [vmem:[%s3645_s12 + $0x10] sm:$0xff] }
  0x34   : > { %s4543_s9 = smov (!%p337_p9, %s3585_s9), 1  ;;  %2962 = vmatpush3.msra.mxu0 %v359_v0  ;;  %v2663_v13 = vld [vmem:[%s4518_s2] ss:$0 sm:$0xff]  ;;  %s3509_s20 = smov 88   ;;  %v498_v47 = vld [vmem:[%s3645_s12 + $0x8] sm:$0xff]  ;;  %v500_v59 = vld [vmem:[%s3645_s12 + $0x18] sm:$0xff] }
  0x35   : > { %s2807_s30 = sshll.u32 %s4543_s9, 6  ;;  %2963 = vmatprep.subr.mxu0 %v358_v1  ;;  %v497_v49 = vld [vmem:[%s3645_s12] sm:$0xff]  ;;  %v502_v0 = vld [vmem:[%s3645_s12 + $0x28] sm:$0xff]  ;;  %s3510_s22 = smov 120   ;;  %vm2279_vm3 = vcmask 195584   ;;  %vm2270_vm4 = vcmask 130048  }
  0x36   : > { %s341_s23 = scalar_lea.vmem %s4516_s0, %s2807_s30  ;;  %2964 = vmatpush3.msra.mxu0 %v358_v1  ;;  %v501_v62 = vld [vmem:[%s3645_s12 + $0x20] sm:$0xff]  ;;  %s3512_s24 = smov 80  }
  0x37   : > { %v348_v2 = vld [vmem:[%s341_s23] sm:$0xff]  ;;  %2965 = vmatprep.subr.mxu0 %v357_v3  ;;  %v349_v5 = vld [vmem:[%s341_s23 + $0x8] sm:$0xff]  ;;  %v350_v6 = vld [vmem:[%s341_s23 + $0x10] sm:$0xff]  ;;  %s3513_s16 = smov 112   ;;  %s3514_s14 = smov 48  }
  0x38   : > { %2969 = vmatprep.mubr.msk.f32.mxu0 %vm367_vm0, %v348_v2  ;;  %2966 = vmatpush3.msra.mxu0 %v357_v3  ;;  %v351_v7 = vld [vmem:[%s341_s23 + $0x18] sm:$0xff]  ;;  %v352_v8 = vld [vmem:[%s341_s23 + $0x20] sm:$0xff]  ;;  %v353_v9 = vld [vmem:[%s341_s23 + $0x28] sm:$0xff]  ;;  %s3515_s15 = smov 72   ;;  %s3516_s17 = smov 104  }
  0x39   : > { %2967 = vmatprep.subr.mxu0 %v356_v4  ;;  %v354_v10 = vld [vmem:[%s341_s23 + $0x30] sm:$0xff]  ;;  %v355_v11 = vld [vmem:[%s341_s23 + $0x38] sm:$0xff]  ;;  %s3511_s23 = smov 56   ;;  %s3517_s18 = smov 40  }
  0x3a   : > { %2968 = vmatpush3.msra.mxu0 %v356_v4  ;;  %s3519_s19 = smov 16   ;;  %s3520_s21 = smov 24  }
  0x3b   : > { %2970 = vmatmul.mubr.msk.f32.vlgmr.msra.gmra.mxu0 %vm367_vm0, %v349_v5  ;;  %v504_v5 = vld [vmem:[%s3645_s12 + $0x38] sm:$0xff]  ;;  %s347_s25 = scalar_lea.vmem %s4524_s8, %s2807_s30 }
  0x3c   : > { %2972 = vmatprep.mubr.msk.f32.mxu0 %vm367_vm0, %v350_v6 }
  0x3f   : > { %2973 = vmatmul.mubr.msk.f32.gmra.mxu0 %vm367_vm0, %v351_v7 }
  0x40   : > { %2975 = vmatprep.mubr.msk.f32.mxu0 %vm367_vm0, %v352_v8 }
  0x43   : > { %2976 = vmatmul.mubr.msk.f32.gmra.mxu0 %vm367_vm0, %v353_v9 }
  0x44   : > { %2978 = vmatprep.mubr.msk.f32.mxu0 %vm367_vm0, %v354_v10 }
  0x47   : > { %2979 = vmatmul.mubr.msk.f32.gmra.mxu0 %vm367_vm0, %v355_v11 }
  0xfb   : > { %v2971_v12 = vpop.f32.mrf.mxu0 }
  0xfc   : > { %v3707_v28 = vadd.f32 %v2971_v12, %v2663_v13  ;;  %v503_v12 = vld [vmem:[%s3645_s12 + $0x30] sm:$0xff] }
  0xfd   : > { %v458_v14 = vpop.f32.mrf.mxu0 }
  0xfe   : > { %v3684_v15 = vadd.f32 %v2663_v13, %v458_v14 }
  0xff   : > { %v2974_v16 = vpop.f32.mrf.mxu0 }
 0x100   : > { %2997 = vmatprep.mubr.msk.f32.mxu1 %vm529_vm1, %v3684_v15  ;;  %v3703_v27 = vadd.f32 %v2974_v16, %v2663_v13 }
 0x101   : > { %v468_v17 = vpop.f32.mrf.mxu0 }
 0x102   : > { %v3697_v25 = vadd.f32 %v2663_v13, %v468_v17 }
 0x103   : > { %v2977_v18 = vpop.f32.mrf.mxu0 }
 0x104   : > { %v3688_v19 = vadd.f32 %v2977_v18, %v2663_v13 }
 0x105   : > { %v478_v20 = vpop.f32.mrf.mxu0 }
 0x106   : > { %523 = vrot.lane.b32.xlu1 %v3688_v19, %s3507_s27  ;;  %v3691_v22 = vadd.f32 %v2663_v13, %v478_v20 }
 0x107   : > { %v2980_v21 = vpop.f32.mrf.mxu0 }
 0x108   : > { %v3693_v23 = vadd.f32 %v2980_v21, %v2663_v13 }
 0x109   : > { %v488_v24 = vpop.f32.mrf.mxu0 }
 0x10a   : > { %527 = vrot.lane.b32.xlu0 %v3693_v23, %s3507_s27  ;;  %521 = vrot.lane.b32.xlu1 %v3691_v22, %s3507_s27  ;;  %v3699_v26 = vadd.f32 %v2663_v13, %v488_v24 }
 0x10e   : > { %525 = vrot.lane.b32.xlu0 %v3699_v26, %s3507_s27  ;;  %517 = vrot.lane.b32.xlu1 %v3697_v25, %s3507_s27 }
 0x112   : > { %519 = vrot.lane.b32.xlu0 %v3703_v27, %s3507_s27  ;;  %513 = vrot.lane.b32.xlu1 %v3684_v15, %s3507_s27 }
 0x116   : > { %515 = vrot.lane.b32.xlu0 %v3707_v28, %s3507_s27  ;;  %746 = vrot.lane.b32.xlu1 %v3703_v27, %s3508_s11 }
 0x11a   : > { %754 = vrot.lane.b32.xlu0 %v3693_v23, %s3508_s11  ;;  %742 = vrot.lane.b32.xlu1 %v3707_v28, %s3508_s11 }
 0x11e   : > { %750 = vrot.lane.b32.xlu0 %v3688_v19, %s3508_s11  ;;  %948 = vrot.lane.b32.xlu1 %v3693_v23, %s3509_s20 }
 0x122   : > { %748 = vrot.lane.b32.xlu0 %v3691_v22, %s3508_s11  ;;  %942 = vrot.lane.b32.xlu1 %v3691_v22, %s3509_s20 }
 0x126   : > { %744 = vrot.lane.b32.xlu0 %v3697_v25, %s3508_s11  ;;  %752 = vrot.lane.b32.xlu1 %v3699_v26, %s3508_s11 }
 0x12a   : > { %740 = vrot.lane.b32.xlu0 %v3684_v15, %s3508_s11  ;;  %946 = vrot.lane.b32.xlu1 %v3699_v26, %s3509_s20 }
 0x12e   : > { %944 = vrot.lane.b32.xlu0 %v3688_v19, %s3509_s20 }
 0x178   : > { %v524_v29 = vpop.permute.xlu1 %523 }
 0x17c   : > { %v528_v30 = vpop.permute.xlu0 %527  ;;  %v522_v31 = vpop.permute.xlu1 %521 }
 0x17d   : > { %2981 = vmatprep.subr.msk.mxu1 %vm529_vm1, %v528_v30 }
 0x17e   : > { %2982 = vmatpush3.xpose.msk.msra.mxu1 %vm529_vm1, %v528_v30 }
 0x180   : > { %v526_v32 = vpop.permute.xlu0 %525  ;;  %v518_v33 = vpop.permute.xlu1 %517 }
 0x181   : > { %2983 = vmatprep.subr.msk.mxu1 %vm529_vm1, %v526_v32 }
 0x182   : > { %2984 = vmatpush3.xpose.msk.msra.mxu1 %vm529_vm1, %v526_v32 }
 0x183   : > { %2985 = vmatprep.subr.msk.mxu1 %vm529_vm1, %v524_v29 }
 0x184   : > { %v520_v34 = vpop.permute.xlu0 %519  ;;  %v514_v35 = vpop.permute.xlu1 %513 }
 0x186   : > { %2986 = vmatpush3.xpose.msk.msra.mxu1 %vm529_vm1, %v524_v29 }
 0x187   : > { %2987 = vmatprep.subr.msk.mxu1 %vm529_vm1, %v522_v31 }
 0x188   : > { %v516_v36 = vpop.permute.xlu0 %515  ;;  %v747_v37 = vpop.permute.xlu1 %746 }
 0x18a   : > { %2988 = vmatpush3.xpose.msk.msra.mxu1 %vm529_vm1, %v522_v31 }
 0x18b   : > { %2989 = vmatprep.subr.msk.mxu1 %vm529_vm1, %v520_v34 }
 0x18c   : > { %v755_v38 = vpop.permute.xlu0 %754  ;;  %v743_v39 = vpop.permute.xlu1 %742 }
 0x18d   : > { %3009 = vmatprep.subr.mxu0 %v755_v38 }
 0x18e   : > { %2990 = vmatpush3.xpose.msk.msra.mxu1 %vm529_vm1, %v520_v34  ;;  %3010 = vmatpush3.msra.mxu0 %v755_v38 }
 0x18f   : > { %2991 = vmatprep.subr.msk.mxu1 %vm529_vm1, %v518_v33 }
 0x190   : > { %v3737_v40 = vpop.permute.xlu1 %948  ;;  %v751_v41 = vpop.permute.xlu0 %750 }
 0x192   : > { %2992 = vmatpush3.xpose.msk.msra.mxu1 %vm529_vm1, %v518_v33 }
 0x193   : > { %2993 = vmatprep.subr.msk.mxu1 %vm529_vm1, %v516_v36 }
 0x194   : > { %v3741_v42 = vpop.permute.xlu1 %942  ;;  %v749_v43 = vpop.permute.xlu0 %748 }
 0x196   : > { %2994 = vmatpush3.xpose.msk.msra.mxu1 %vm529_vm1, %v516_v36 }
 0x197   : > { %2995 = vmatprep.subr.msk.mxu1 %vm529_vm1, %v514_v35 }
 0x198   : > { %v753_v44 = vpop.permute.xlu1 %752  ;;  %v745_v45 = vpop.permute.xlu0 %744 }
 0x199   : > { %3011 = vmatprep.subr.mxu0 %v753_v44 }
 0x19a   : > { %2996 = vmatpush3.xpose.msk.msra.mxu1 %vm529_vm1, %v514_v35  ;;  %3012 = vmatpush3.msra.mxu0 %v753_v44 }
 0x19b   : > { %3013 = vmatprep.subr.mxu0 %v751_v41 }
 0x19c   : > { %3014 = vmatpush3.msra.mxu0 %v751_v41  ;;  %v741_v46 = vpop.permute.xlu0 %740  ;;  %v947_v16 = vpop.permute.xlu1 %946 }
 0x19d   : > { %2998 = vmatmul.mubr.msk.f32.vlgmr.msra.gmra.mxu1 %vm529_vm1, %v3707_v28  ;;  %3015 = vmatprep.subr.mxu0 %v749_v43 }
 0x19e   : > { %3000 = vmatprep.mubr.msk.f32.mxu1 %vm529_vm1, %v3697_v25  ;;  %3016 = vmatpush3.msra.mxu0 %v749_v43 }
 0x19f   : > { %3017 = vmatprep.subr.mxu0 %v747_v37 }
 0x1a0   : > { %3018 = vmatpush3.msra.mxu0 %v747_v37  ;;  %v945_v17 = vpop.permute.xlu0 %944 }
 0x1a1   : > { %3001 = vmatmul.mubr.msk.f32.gmra.mxu1 %vm529_vm1, %v3703_v27  ;;  %3019 = vmatprep.subr.mxu0 %v745_v45 }
 0x1a2   : > { %3003 = vmatprep.mubr.msk.f32.mxu1 %vm529_vm1, %v3691_v22  ;;  %3020 = vmatpush3.msra.mxu0 %v745_v45 }
 0x1a3   : > { %3021 = vmatprep.subr.mxu0 %v743_v39 }
 0x1a4   : > { %3022 = vmatpush3.msra.mxu0 %v743_v39 }
 0x1a5   : > { %3004 = vmatmul.mubr.msk.f32.gmra.mxu1 %vm529_vm1, %v3688_v19  ;;  %3023 = vmatprep.subr.mxu0 %v741_v46 }
 0x1a6   : > { %3006 = vmatprep.mubr.msk.f32.mxu1 %vm529_vm1, %v3699_v26  ;;  %3024 = vmatpush3.msra.mxu0 %v741_v46 }
 0x1a7   : > { %3037 = vmatprep.subr.msk.mxu0 %vm529_vm1, %v3737_v40 }
 0x1a9   : > { %3007 = vmatmul.mubr.msk.f32.gmra.mxu1 %vm529_vm1, %v3693_v23 }
 0x25d   : > { %v2999_v48 = vpop.f32.mrf.mxu1 }
 0x25e   : > { %v3764_v50 = vadd.f32 %v2999_v48, %v498_v47 }
 0x25f   : > { %v628_v51 = vpop.f32.mrf.mxu1 }
 0x260   : > { %v3766_v52 = vadd.f32 %v628_v51, %v497_v49  ;;  %v671_v53 = vsel %vm667_vm2, %v3764_v50, -inf }
 0x261   : > { %672 = vmax.xlane.f32.xlu1 %v671_v53  ;;  %v3002_v55 = vpop.f32.mrf.mxu1 }
 0x262   : > { %v668_v54 = vsel %vm667_vm2, %v3766_v52, -inf  ;;  %v3781_v63 = vadd.f32 %v3002_v55, %v500_v59 }
 0x263   : > { %669 = vmax.xlane.f32.xlu0 %v668_v54  ;;  %v638_v56 = vpop.f32.mrf.mxu1 }
 0x264   : > { %v3778_v60 = vadd.f32 %v638_v56, %v499_v57  ;;  %v677_v4 = vsel %vm667_vm2, %v3781_v63, -inf }
 0x265   : > { %v3005_v58 = vpop.f32.mrf.mxu1 }
 0x266   : > { %v674_v2 = vsel %vm667_vm2, %v3778_v60, -inf  ;;  %v3788_v3 = vadd.f32 %v3005_v58, %v502_v0 }
 0x267   : > { %v648_v61 = vpop.f32.mrf.mxu1 }
 0x268   : > { %v3784_v1 = vadd.f32 %v648_v61, %v501_v62  ;;  %v683_v9 = vsel %vm667_vm2, %v3788_v3, -inf }
 0x269   : > { %v3008_v6 = vpop.f32.mrf.mxu1 }
 0x26a   : > { %v680_v7 = vsel %vm667_vm2, %v3784_v1, -inf  ;;  %v3795_v8 = vadd.f32 %v3008_v6, %v504_v5 }
 0x26b   : > { %v658_v11 = vpop.f32.mrf.mxu1 }
 0x26c   : > { %v689_v10 = vsel %vm667_vm2, %v3795_v8, -inf  ;;  %v3810_v13 = vadd.f32 %v658_v11, %v503_v12 }
 0x26e   : > { %v686_v14 = vsel %vm667_vm2, %v3810_v13, -inf }
 0x272   : > { %938 = vrot.lane.b32.xlu1 %v3697_v25, %s3509_s20 }
 0x279   : > { %940 = vrot.lane.b32.xlu0 %v3703_v27, %s3509_s20 }
 0x296   : > { %675 = vmax.xlane.f32.xlu1 %v674_v2 }
 0x298   : > { %678 = vmax.xlane.f32.xlu0 %v677_v4 }
 0x29a   : > { %681 = vmax.xlane.f32.xlu1 %v680_v7 }
 0x29c   : > { %684 = vmax.xlane.f32.xlu0 %v683_v9 }
 0x2a0   : > { %690 = vmax.xlane.f32.xlu0 %v689_v10 }
 0x2ab   : > { %934 = vrot.lane.b32.xlu1 %v3684_v15, %s3509_s20 }
 0x2b6   : > { %936 = vrot.lane.b32.xlu0 %v3707_v28, %s3509_s20 }
 0x2ba   : > { %918 = vrot.lane.b32.xlu0 %v3684_v15, %s3510_s22 }
 0x2be   : > { %922 = vrot.lane.b32.xlu0 %v3697_v25, %s3510_s22 }
 0x2c2   : > { %926 = vrot.lane.b32.xlu0 %v3691_v22, %s3510_s22 }
 0x2c6   : > { %930 = vrot.lane.b32.xlu0 %v3699_v26, %s3510_s22 }
 0x2ca   : > { %1173 = vrot.lane.b32.xlu0 %v3693_v23, %s3511_s23 }
 0x2ce   : > { %1169 = vrot.lane.b32.xlu0 %v3688_v19, %s3511_s23 }
 0x2cf   : > { %687 = vmax.xlane.f32.xlu1 %v686_v14 }
 0x2d2   : > { %1167 = vrot.lane.b32.xlu0 %v3691_v22, %s3511_s23 }
 0x2d6   : > { %1163 = vrot.lane.b32.xlu0 %v3697_v25, %s3511_s23 }
 0x2da   : > { %1159 = vrot.lane.b32.xlu0 %v3684_v15, %s3511_s23 }
 0x2de   : > { %1363 = vrot.lane.b32.xlu0 %v3688_v19, %s3512_s24 }
 0x2e0   : > { %920 = vrot.lane.b32.xlu1 %v3707_v28, %s3510_s22 }
 0x2e4   : > { %924 = vrot.lane.b32.xlu1 %v3703_v27, %s3510_s22 }
 0x2e8   : > { %928 = vrot.lane.b32.xlu1 %v3688_v19, %s3510_s22 }
 0x2ea   : > { %v673_v18 = vpop.xlane.xlu1 %672 }
 0x2eb   : > { %v693_v20 = vsub.f32 %v3764_v50, %v673_v18 }
 0x2ec   : > { %932 = vrot.lane.b32.xlu1 %v3693_v23, %s3510_s22  ;;  %v670_v21 = vpop.xlane.xlu0 %669 }
 0x2ed   : > { %v692_v24 = vsub.f32 %v3766_v52, %v670_v21  ;;  %v702_v29 = vmul.f32 1.442695, %v693_v20 }
 0x2ee   : > { %v939_v34 = vpop.permute.xlu1 %938 }
 0x2ef   : > { %v700_v30 = vmul.f32 1.442695, %v692_v24 }
 0x2f0   : > { %1171 = vrot.lane.b32.xlu1 %v3699_v26, %s3511_s23  ;;  %v941_v33 = vpop.permute.xlu0 %940 }
 0x2f1   : > { %3296 = vpow2.f32 %v700_v30  ;;  %v2697_v30 = vld [vmem:[%s3645_s12 + $0x48] sm:$0xff] }
 0x2f2   : > { %3298 = vpow2.f32 %v702_v29 }
 0x2f4   : > { %1165 = vrot.lane.b32.xlu1 %v3703_v27, %s3511_s23 }
 0x2f8   : > { %1161 = vrot.lane.b32.xlu1 %v3707_v28, %s3511_s23 }
 0x2fc   : > { %1367 = vrot.lane.b32.xlu1 %v3693_v23, %s3512_s24 }
 0x2fe   : > { %v3832_v31 = vpop.eup %3296 }
 0x2ff   : > { %v3834_v32 = vpop.eup %3298  ;;  %3025 = vmatprep.mubr.msk.f32.mxu0 %vm667_vm2, %v3832_v31 }
 0x300   : > { %1365 = vrot.lane.b32.xlu1 %v3699_v26, %s3512_s24  ;;  %3026 = vmatmul.mubr.msk.f32.vlgmr.msra.gmra.mxu0 %vm667_vm2, %v3834_v32 }
 0x301   : > { %3038 = vmatpush3.xpose.msk.msra.mxu0 %vm529_vm1, %v3737_v40 }
 0x302   : > { %3039 = vmatprep.subr.msk.mxu0 %vm529_vm1, %v947_v16 }
 0x304   : > { %1361 = vrot.lane.b32.xlu1 %v3691_v22, %s3512_s24 }
 0x305   : > { %3040 = vmatpush3.xpose.msk.msra.mxu0 %vm529_vm1, %v947_v16 }
 0x306   : > { %3041 = vmatprep.subr.msk.mxu0 %vm529_vm1, %v945_v17 }
 0x309   : > { %3042 = vmatpush3.xpose.msk.msra.mxu0 %vm529_vm1, %v945_v17 }
 0x30a   : > { %3043 = vmatprep.subr.msk.mxu0 %vm529_vm1, %v3741_v42 }
 0x30d   : > { %3044 = vmatpush3.xpose.msk.msra.mxu0 %vm529_vm1, %v3741_v42 }
 0x30e   : > { %3045 = vmatprep.subr.msk.mxu0 %vm529_vm1, %v941_v33 }
 0x311   : > { %3046 = vmatpush3.xpose.msk.msra.mxu0 %vm529_vm1, %v941_v33 }
 0x312   : > { %3047 = vmatprep.subr.msk.mxu0 %vm529_vm1, %v939_v34 }
 0x315   : > { %3048 = vmatpush3.xpose.msk.msra.mxu0 %vm529_vm1, %v939_v34  ;;  %v2696_v34 = vld [vmem:[%s3645_s12 + $0x40] sm:$0xff] }
 0x31f   : > { %v676_v35 = vpop.xlane.xlu1 %675 }
 0x320   : > { %v694_v36 = vsub.f32 %v3778_v60, %v676_v35 }
 0x321   : > { %v679_v37 = vpop.xlane.xlu0 %678 }
 0x322   : > { %v704_v38 = vmul.f32 1.442695, %v694_v36  ;;  %v695_v39 = vsub.f32 %v3781_v63, %v679_v37 }
 0x323   : > { %v682_v40 = vpop.xlane.xlu1 %681 }
 0x324   : > { %3300 = vpow2.f32 %v704_v38  ;;  %v706_v41 = vmul.f32 1.442695, %v695_v39  ;;  %v696_v42 = vsub.f32 %v3784_v1, %v682_v40 }
 0x325   : > { %v685_v43 = vpop.xlane.xlu0 %684 }
 0x326   : > { %3302 = vpow2.f32 %v706_v41  ;;  %v708_v44 = vmul.f32 1.442695, %v696_v42  ;;  %v697_v45 = vsub.f32 %v3788_v3, %v685_v43  ;;  %v2698_v42 = vld [vmem:[%s3645_s12 + $0x50] sm:$0xff] }
 0x327   : > { %v935_v49 = vpop.permute.xlu1 %934 }
 0x328   : > { %3304 = vpow2.f32 %v708_v44  ;;  %v710_v46 = vmul.f32 1.442695, %v697_v45  ;;  %v2699_v44 = vld [vmem:[%s3645_s12 + $0x58] sm:$0xff] }
 0x329   : > { %v691_v47 = vpop.xlane.xlu0 %690 }
 0x32a   : > { %3306 = vpow2.f32 %v710_v46  ;;  %v699_v59 = vsub.f32 %v3795_v8, %v691_v47  ;;  %v2700_v47 = vld [vmem:[%s3645_s12 + $0x60] sm:$0xff] }
 0x32c   : > { %v714_v62 = vmul.f32 1.442695, %v699_v59 }
 0x32d   : > { %v937_v48 = vpop.permute.xlu0 %936 }
 0x32e   : > { %3049 = vmatprep.subr.msk.mxu0 %vm529_vm1, %v937_v48 }
 0x32f   : > { %3050 = vmatpush3.xpose.msk.msra.mxu0 %vm529_vm1, %v937_v48 }
 0x330   : > { %3051 = vmatprep.subr.msk.mxu0 %vm529_vm1, %v935_v49 }
 0x331   : > { %v3865_v50 = vpop.eup %3300  ;;  %v919_v51 = vpop.permute.xlu0 %918 }
 0x332   : > { %3028 = vmatprep.mubr.msk.f32.mxu0 %vm667_vm2, %v3865_v50 }
 0x333   : > { %v3869_v52 = vpop.eup %3302  ;;  %3052 = vmatpush3.xpose.msk.msra.mxu0 %vm529_vm1, %v935_v49  ;;  %v2701_v49 = vld [vmem:[%s3645_s12 + $0x68] sm:$0xff] }
 0x334   : > { %3029 = vmatmul.mubr.msk.f32.gmra.mxu0 %vm667_vm2, %v3869_v52 }
 0x335   : > { %v3874_v53 = vpop.eup %3304  ;;  %v923_v54 = vpop.permute.xlu0 %922 }
 0x336   : > { %3031 = vmatprep.mubr.msk.f32.mxu0 %vm667_vm2, %v3874_v53 }
 0x337   : > { %v3878_v55 = vpop.eup %3306 }
 0x338   : > { %3032 = vmatmul.mubr.msk.f32.gmra.mxu0 %vm667_vm2, %v3878_v55 }
 0x339   : > { %v927_v56 = vpop.permute.xlu0 %926 }
 0x33d   : > { %v931_v57 = vpop.permute.xlu0 %930 }
 0x341   : > { %v1174_v58 = vpop.permute.xlu0 %1173 }
 0x342   : > { %3065 = vmatprep.subr.mxu1 %v1174_v58 }
 0x343   : > { %3066 = vmatpush3.msra.mxu1 %v1174_v58  ;;  %v2703_v58 = vld [vmem:[%s3645_s12 + $0x78] sm:$0xff] }
 0x345   : > { %v1170_v3 = vpop.permute.xlu0 %1169 }
 0x349   : > { %v1168_v7 = vpop.permute.xlu0 %1167 }
 0x34d   : > { %v1164_v10 = vpop.permute.xlu0 %1163 }
 0x351   : > { %v1160_v12 = vpop.permute.xlu0 %1159 }
 0x358   : > { %v688_v60 = vpop.xlane.xlu1 %687 }
 0x359   : > { %v698_v61 = vsub.f32 %v3810_v13, %v688_v60 }
 0x35b   : > { %v712_v63 = vmul.f32 1.442695, %v698_v61 }
 0x35c   : > { %v921_v0 = vpop.permute.xlu1 %920 }
 0x35d   : > { %3308 = vpow2.f32 %v712_v63 }
 0x35e   : > { %3310 = vpow2.f32 %v714_v62 }
 0x360   : > { %v925_v1 = vpop.permute.xlu1 %924 }
 0x364   : > { %v929_v2 = vpop.permute.xlu1 %928 }
 0x368   : > { %v933_v4 = vpop.permute.xlu1 %932 }
 0x36a   : > { %v3884_v5 = vpop.eup %3308 }
 0x36b   : > { %v3886_v6 = vpop.eup %3310  ;;  %3034 = vmatprep.mubr.msk.f32.mxu0 %vm667_vm2, %v3884_v5 }
 0x36c   : > { %v1172_v8 = vpop.permute.xlu1 %1171  ;;  %3035 = vmatmul.mubr.msk.f32.gmra.mxu0 %vm667_vm2, %v3886_v6 }
 0x36d   : > { %3053 = vmatprep.mubr.msk.f32.mxu0 %vm529_vm1, %v919_v51  ;;  %3067 = vmatprep.subr.mxu1 %v1172_v8 }
 0x36e   : > { %3068 = vmatpush3.msra.mxu1 %v1172_v8  ;;  %v1364_v8 = vpop.permute.xlu0 %1363 }
 0x36f   : > { %3069 = vmatprep.subr.mxu1 %v1170_v3 }
 0x370   : > { %v1166_v9 = vpop.permute.xlu1 %1165  ;;  %3054 = vmatmul.mubr.msk.f32.vlgmr.msra.gmra.mxu0 %vm529_vm1, %v921_v0  ;;  %3070 = vmatpush3.msra.mxu1 %v1170_v3 }
 0x371   : > { %3056 = vmatprep.mubr.msk.f32.mxu0 %vm529_vm1, %v923_v54  ;;  %3071 = vmatprep.subr.mxu1 %v1168_v7 }
 0x372   : > { %3072 = vmatpush3.msra.mxu1 %v1168_v7 }
 0x373   : > { %3073 = vmatprep.subr.mxu1 %v1166_v9 }
 0x374   : > { %v1162_v11 = vpop.permute.xlu1 %1161  ;;  %3057 = vmatmul.mubr.msk.f32.gmra.mxu0 %vm529_vm1, %v925_v1  ;;  %3074 = vmatpush3.msra.mxu1 %v1166_v9  ;;  %v2702_v1 = vld [vmem:[%s3645_s12 + $0x70] sm:$0xff] }
 0x375   : > { %3059 = vmatprep.mubr.msk.f32.mxu0 %vm529_vm1, %v927_v56  ;;  %3075 = vmatprep.subr.mxu1 %v1164_v10 }
 0x376   : > { %3076 = vmatpush3.msra.mxu1 %v1164_v10 }
 0x377   : > { %3077 = vmatprep.subr.mxu1 %v1162_v11 }
 0x378   : > { %3060 = vmatmul.mubr.msk.f32.gmra.mxu0 %vm529_vm1, %v929_v2  ;;  %3078 = vmatpush3.msra.mxu1 %v1162_v11  ;;  %v3899_v13 = vpop.permute.xlu1 %1367 }
 0x379   : > { %3062 = vmatprep.mubr.msk.f32.mxu0 %vm529_vm1, %v931_v57  ;;  %3079 = vmatprep.subr.mxu1 %v1160_v12 }
 0x37a   : > { %3080 = vmatpush3.msra.mxu1 %v1160_v12 }
 0x37b   : > { %3093 = vmatprep.subr.msk.mxu1 %vm529_vm1, %v3899_v13 }
 0x37c   : > { %3063 = vmatmul.mubr.msk.f32.gmra.mxu0 %vm529_vm1, %v933_v4  ;;  %v1366_v4 = vpop.permute.xlu1 %1365 }
 0x380   : > { %v1362_v7 = vpop.permute.xlu1 %1361 }
 0x3c0   : > { %v3904_v14 = vpop.f32.mrf.mxu0 }
 0x3c2   : > { %v3906_v16 = vpop.f32.mrf.mxu0 }
 0x3f4   : > { %v3908_v17 = vpop.f32.mrf.mxu0 }
 0x3f6   : > { %v3910_v18 = vpop.f32.mrf.mxu0 }
 0x3f8   : > { %v3912_v20 = vpop.f32.mrf.mxu0 }
 0x3f9   : > { %4530 = vst [vmem:[#allocation5_spill] sm:$0xff] %v3912_v20  ;;  %v2767_v20 = vld [vmem:[%s3645_s12 + $0xf8] sm:$0xff] }
 0x3fa   : > { %v3914_v21 = vpop.f32.mrf.mxu0 }
 0x3fb   : > { %4531 = vst [vmem:[#allocation6_spill] sm:$0xff] %v3914_v21 }
 0x42c   : > { %v3916_v24 = vpop.f32.mrf.mxu0 }
 0x42d   : > { %4532 = vst [vmem:[#allocation7_spill] sm:$0xff] %v3916_v24 }
 0x42e   : > { %v3918_v29 = vpop.f32.mrf.mxu0 }
 0x42f   : > { %4533 = vst [vmem:[#allocation8_spill] sm:$0xff] %v3918_v29 }
 0x430   : > { %v3055_v33 = vpop.f32.mrf.mxu0 }
 0x431   : > { %v3922_v35 = vadd.f32 %v3055_v33, %v2697_v30 }
 0x432   : > { %v1048_v36 = vpop.f32.mrf.mxu0 }
 0x433   : > { %v3924_v37 = vadd.f32 %v2696_v34, %v1048_v36  ;;  %v1090_v38 = vsel %vm667_vm2, %v3922_v35, -inf }
 0x434   : > { %1091 = vmax.xlane.f32.xlu1 %v1090_v38  ;;  %v3058_v40 = vpop.f32.mrf.mxu0 }
 0x435   : > { %v1087_v39 = vsel %vm667_vm2, %v3924_v37, -inf  ;;  %v3939_v48 = vadd.f32 %v3058_v40, %v2699_v44 }
 0x436   : > { %1088 = vmax.xlane.f32.xlu0 %v1087_v39  ;;  %v1058_v41 = vpop.f32.mrf.mxu0 }
 0x437   : > { %v3936_v45 = vadd.f32 %v2698_v42, %v1058_v41  ;;  %v1096_v57 = vsel %vm667_vm2, %v3939_v48, -inf }
 0x438   : > { %v3061_v43 = vpop.f32.mrf.mxu0 }
 0x439   : > { %v1093_v54 = vsel %vm667_vm2, %v3936_v45, -inf  ;;  %v3946_v56 = vadd.f32 %v3061_v43, %v2701_v49 }
 0x43a   : > { %v1068_v46 = vpop.f32.mrf.mxu0 }
 0x43b   : > { %v3942_v51 = vadd.f32 %v2700_v47, %v1068_v46  ;;  %v1102_v62 = vsel %vm667_vm2, %v3946_v56, -inf }
 0x43c   : > { %v3064_v59 = vpop.f32.mrf.mxu0 }
 0x43d   : > { %v1099_v60 = vsel %vm667_vm2, %v3942_v51, -inf  ;;  %v3953_v61 = vadd.f32 %v3064_v59, %v2703_v58 }
 0x43e   : > { %v1078_v0 = vpop.f32.mrf.mxu0 }
 0x43f   : > { %v1108_v63 = vsel %vm667_vm2, %v3953_v61, -inf  ;;  %v3968_v2 = vadd.f32 %v2702_v1, %v1078_v0 }
 0x441   : > { %v1105_v3 = vsel %vm667_vm2, %v3968_v2, -inf }
 0x445   : > { %1357 = vrot.lane.b32.xlu1 %v3697_v25, %s3512_s24 }
 0x44c   : > { %1359 = vrot.lane.b32.xlu0 %v3703_v27, %s3512_s24 }
 0x469   : > { %1094 = vmax.xlane.f32.xlu1 %v1093_v54 }
 0x46b   : > { %1097 = vmax.xlane.f32.xlu0 %v1096_v57 }
 0x46d   : > { %1100 = vmax.xlane.f32.xlu1 %v1099_v60 }
 0x46f   : > { %1103 = vmax.xlane.f32.xlu0 %v1102_v62 }
 0x473   : > { %1109 = vmax.xlane.f32.xlu0 %v1108_v63 }
 0x47e   : > { %1353 = vrot.lane.b32.xlu1 %v3684_v15, %s3512_s24 }
 0x489   : > { %1355 = vrot.lane.b32.xlu0 %v3707_v28, %s3512_s24 }
 0x48d   : > { %1337 = vrot.lane.b32.xlu0 %v3684_v15, %s3513_s16 }
 0x491   : > { %1341 = vrot.lane.b32.xlu0 %v3697_v25, %s3513_s16 }
 0x495   : > { %1345 = vrot.lane.b32.xlu0 %v3691_v22, %s3513_s16 }
 0x499   : > { %1349 = vrot.lane.b32.xlu0 %v3699_v26, %s3513_s16 }
 0x49d   : > { %1592 = vrot.lane.b32.xlu0 %v3693_v23, %s3514_s14 }
 0x4a1   : > { %1588 = vrot.lane.b32.xlu0 %v3688_v19, %s3514_s14 }
 0x4a2   : > { %1106 = vmax.xlane.f32.xlu1 %v1105_v3 }
 0x4a5   : > { %1586 = vrot.lane.b32.xlu0 %v3691_v22, %s3514_s14 }
 0x4a9   : > { %1582 = vrot.lane.b32.xlu0 %v3697_v25, %s3514_s14 }
 0x4ad   : > { %1578 = vrot.lane.b32.xlu0 %v3684_v15, %s3514_s14 }
 0x4b1   : > { %1782 = vrot.lane.b32.xlu0 %v3688_v19, %s3515_s15 }
 0x4b3   : > { %1339 = vrot.lane.b32.xlu1 %v3707_v28, %s3513_s16 }
 0x4b7   : > { %1343 = vrot.lane.b32.xlu1 %v3703_v27, %s3513_s16 }
 0x4bb   : > { %1347 = vrot.lane.b32.xlu1 %v3688_v19, %s3513_s16 }
 0x4bd   : > { %v1092_v9 = vpop.xlane.xlu1 %1091 }
 0x4be   : > { %v1112_v10 = vsub.f32 %v3922_v35, %v1092_v9 }
 0x4bf   : > { %1351 = vrot.lane.b32.xlu1 %v3693_v23, %s3513_s16  ;;  %v1089_v11 = vpop.xlane.xlu0 %1088 }
 0x4c0   : > { %v1111_v12 = vsub.f32 %v3924_v37, %v1089_v11  ;;  %v1121_v30 = vmul.f32 1.442695, %v1112_v10 }
 0x4c1   : > { %v1358_v37 = vpop.permute.xlu1 %1357 }
 0x4c2   : > { %v1119_v33 = vmul.f32 1.442695, %v1111_v12 }
 0x4c3   : > { %1590 = vrot.lane.b32.xlu1 %v3699_v26, %s3514_s14  ;;  %v1360_v36 = vpop.permute.xlu0 %1359 }
 0x4c4   : > { %3312 = vpow2.f32 %v1119_v33 }
 0x4c5   : > { %3314 = vpow2.f32 %v1121_v30 }
 0x4c7   : > { %1584 = vrot.lane.b32.xlu1 %v3703_v27, %s3514_s14 }
 0x4cb   : > { %1580 = vrot.lane.b32.xlu1 %v3707_v28, %s3514_s14 }
 0x4cf   : > { %1786 = vrot.lane.b32.xlu1 %v3693_v23, %s3515_s15 }
 0x4d1   : > { %v3990_v34 = vpop.eup %3312 }
 0x4d2   : > { %v3992_v35 = vpop.eup %3314  ;;  %3081 = vmatprep.mubr.msk.f32.mxu1 %vm667_vm2, %v3990_v34 }
 0x4d3   : > { %1784 = vrot.lane.b32.xlu1 %v3699_v26, %s3515_s15  ;;  %3082 = vmatmul.mubr.msk.f32.vlgmr.msra.gmra.mxu1 %vm667_vm2, %v3992_v35 }
 0x4d4   : > { %3094 = vmatpush3.xpose.msk.msra.mxu1 %vm529_vm1, %v3899_v13 }
 0x4d5   : > { %3095 = vmatprep.subr.msk.mxu1 %vm529_vm1, %v1366_v4 }
 0x4d7   : > { %1780 = vrot.lane.b32.xlu1 %v3691_v22, %s3515_s15 }
 0x4d8   : > { %3096 = vmatpush3.xpose.msk.msra.mxu1 %vm529_vm1, %v1366_v4 }
 0x4d9   : > { %3097 = vmatprep.subr.msk.mxu1 %vm529_vm1, %v1364_v8 }
 0x4dc   : > { %3098 = vmatpush3.xpose.msk.msra.mxu1 %vm529_vm1, %v1364_v8 }
 0x4dd   : > { %3099 = vmatprep.subr.msk.mxu1 %vm529_vm1, %v1362_v7 }
 0x4e0   : > { %3100 = vmatpush3.xpose.msk.msra.mxu1 %vm529_vm1, %v1362_v7 }
 0x4e1   : > { %3101 = vmatprep.subr.msk.mxu1 %vm529_vm1, %v1360_v36 }
 0x4e4   : > { %3102 = vmatpush3.xpose.msk.msra.mxu1 %vm529_vm1, %v1360_v36 }
 0x4e5   : > { %3103 = vmatprep.subr.msk.mxu1 %vm529_vm1, %v1358_v37 }
 0x4e8   : > { %3104 = vmatpush3.xpose.msk.msra.mxu1 %vm529_vm1, %v1358_v37 }
 0x4f2   : > { %v1095_v13 = vpop.xlane.xlu1 %1094 }
 0x4f3   : > { %v1113_v38 = vsub.f32 %v3936_v45, %v1095_v13 }
 0x4f4   : > { %v1098_v39 = vpop.xlane.xlu0 %1097 }
 0x4f5   : > { %v1123_v40 = vmul.f32 1.442695, %v1113_v38  ;;  %v1114_v41 = vsub.f32 %v3939_v48, %v1098_v39 }
 0x4f6   : > { %v1101_v42 = vpop.xlane.xlu1 %1100 }
 0x4f7   : > { %3316 = vpow2.f32 %v1123_v40  ;;  %v1125_v43 = vmul.f32 1.442695, %v1114_v41  ;;  %v1115_v44 = vsub.f32 %v3942_v51, %v1101_v42 }
 0x4f8   : > { %v1104_v46 = vpop.xlane.xlu0 %1103 }
 0x4f9   : > { %3318 = vpow2.f32 %v1125_v43  ;;  %v1127_v47 = vmul.f32 1.442695, %v1115_v44  ;;  %v1116_v49 = vsub.f32 %v3946_v56, %v1104_v46 }
 0x4fa   : > { %v1354_v45 = vpop.permute.xlu1 %1353 }
 0x4fb   : > { %3320 = vpow2.f32 %v1127_v47  ;;  %v1129_v54 = vmul.f32 1.442695, %v1116_v49 }
 0x4fc   : > { %v1110_v57 = vpop.xlane.xlu0 %1109 }
 0x4fd   : > { %3322 = vpow2.f32 %v1129_v54  ;;  %v1118_v3 = vsub.f32 %v3953_v61, %v1110_v57 }
 0x4ff   : > { %v1133_v8 = vmul.f32 1.442695, %v1118_v3 }
 0x500   : > { %v1356_v58 = vpop.permute.xlu0 %1355 }
 0x501   : > { %3105 = vmatprep.subr.msk.mxu1 %vm529_vm1, %v1356_v58 }
 0x502   : > { %3106 = vmatpush3.xpose.msk.msra.mxu1 %vm529_vm1, %v1356_v58  ;;  %v2729_v58 = vld [vmem:[%s3645_s12 + $0x88] sm:$0xff] }
 0x503   : > { %3107 = vmatprep.subr.msk.mxu1 %vm529_vm1, %v1354_v45 }
 0x504   : > { %v4021_v48 = vpop.eup %3316  ;;  %v1338_v51 = vpop.permute.xlu0 %1337 }
 0x505   : > { %3084 = vmatprep.mubr.msk.f32.mxu1 %vm667_vm2, %v4021_v48 }
 0x506   : > { %v4025_v59 = vpop.eup %3318  ;;  %3108 = vmatpush3.xpose.msk.msra.mxu1 %vm529_vm1, %v1354_v45 }
 0x507   : > { %3085 = vmatmul.mubr.msk.f32.gmra.mxu1 %vm667_vm2, %v4025_v59 }
 0x508   : > { %v4030_v56 = vpop.eup %3320  ;;  %v1342_v60 = vpop.permute.xlu0 %1341 }
 0x509   : > { %3087 = vmatprep.mubr.msk.f32.mxu1 %vm667_vm2, %v4030_v56 }
 0x50a   : > { %v4034_v62 = vpop.eup %3322 }
 0x50b   : > { %3088 = vmatmul.mubr.msk.f32.gmra.mxu1 %vm667_vm2, %v4034_v62 }
 0x50c   : > { %v1346_v63 = vpop.permute.xlu0 %1345 }
 0x510   : > { %v1350_v0 = vpop.permute.xlu0 %1349 }
 0x514   : > { %v1593_v1 = vpop.permute.xlu0 %1592 }
 0x515   : > { %3121 = vmatprep.subr.mxu0 %v1593_v1 }
 0x516   : > { %3122 = vmatpush3.msra.mxu0 %v1593_v1 }
 0x518   : > { %v1589_v30 = vpop.permute.xlu0 %1588 }
 0x51c   : > { %v1587_v61 = vpop.permute.xlu0 %1586 }
 0x520   : > { %v1583_v38 = vpop.permute.xlu0 %1582 }
 0x524   : > { %v1579_v40 = vpop.permute.xlu0 %1578 }
 0x52b   : > { %v1107_v4 = vpop.xlane.xlu1 %1106 }
 0x52c   : > { %v1117_v7 = vsub.f32 %v3968_v2, %v1107_v4 }
 0x52e   : > { %v1131_v9 = vmul.f32 1.442695, %v1117_v7 }
 0x52f   : > { %v1340_v10 = vpop.permute.xlu1 %1339 }
 0x530   : > { %3324 = vpow2.f32 %v1131_v9 }
 0x531   : > { %3326 = vpow2.f32 %v1133_v8  ;;  %v2730_v8 = vld [vmem:[%s3645_s12 + $0x90] sm:$0xff] }
 0x533   : > { %v1344_v11 = vpop.permute.xlu1 %1343 }
 0x537   : > { %v1348_v12 = vpop.permute.xlu1 %1347 }
 0x53b   : > { %v1352_v33 = vpop.permute.xlu1 %1351 }
 0x53d   : > { %v4040_v36 = vpop.eup %3324 }
 0x53e   : > { %v4042_v37 = vpop.eup %3326  ;;  %3090 = vmatprep.mubr.msk.f32.mxu1 %vm667_vm2, %v4040_v36 }
 0x53f   : > { %v1591_v13 = vpop.permute.xlu1 %1590  ;;  %3091 = vmatmul.mubr.msk.f32.gmra.mxu1 %vm667_vm2, %v4042_v37 }
 0x540   : > { %3109 = vmatprep.mubr.msk.f32.mxu1 %vm529_vm1, %v1338_v51  ;;  %3123 = vmatprep.subr.mxu0 %v1591_v13  ;;  %v2728_v51 = vld [vmem:[%s3645_s12 + $0x80] sm:$0xff] }
 0x541   : > { %3124 = vmatpush3.msra.mxu0 %v1591_v13 }
 0x542   : > { %3125 = vmatprep.subr.mxu0 %v1589_v30 }
 0x543   : > { %v1585_v2 = vpop.permute.xlu1 %1584  ;;  %3110 = vmatmul.mubr.msk.f32.vlgmr.msra.gmra.mxu1 %vm529_vm1, %v1340_v10  ;;  %3126 = vmatpush3.msra.mxu0 %v1589_v30  ;;  %v2731_v10 = vld [vmem:[%s3645_s12 + $0x98] sm:$0xff]  ;;  %v2732_v30 = vld [vmem:[%s3645_s12 + $0xa0] sm:$0xff] }
 0x544   : > { %3112 = vmatprep.mubr.msk.f32.mxu1 %vm529_vm1, %v1342_v60  ;;  %3127 = vmatprep.subr.mxu0 %v1587_v61 }
 0x545   : > { %3128 = vmatpush3.msra.mxu0 %v1587_v61  ;;  %v2733_v61 = vld [vmem:[%s3645_s12 + $0xa8] sm:$0xff] }
 0x546   : > { %3129 = vmatprep.subr.mxu0 %v1585_v2 }
 0x547   : > { %v1581_v39 = vpop.permute.xlu1 %1580  ;;  %3113 = vmatmul.mubr.msk.f32.gmra.mxu1 %vm529_vm1, %v1344_v11  ;;  %3130 = vmatpush3.msra.mxu0 %v1585_v2 }
 0x548   : > { %3115 = vmatprep.mubr.msk.f32.mxu1 %vm529_vm1, %v1346_v63  ;;  %3131 = vmatprep.subr.mxu0 %v1583_v38 }
 0x549   : > { %3132 = vmatpush3.msra.mxu0 %v1583_v38 }
 0x54a   : > { %3133 = vmatprep.subr.mxu0 %v1581_v39 }
 0x54b   : > { %3116 = vmatmul.mubr.msk.f32.gmra.mxu1 %vm529_vm1, %v1348_v12  ;;  %3134 = vmatpush3.msra.mxu0 %v1581_v39  ;;  %v4055_v41 = vpop.permute.xlu1 %1786 }
 0x54c   : > { %3118 = vmatprep.mubr.msk.f32.mxu1 %vm529_vm1, %v1350_v0  ;;  %3135 = vmatprep.subr.mxu0 %v1579_v40 }
 0x54d   : > { %3136 = vmatpush3.msra.mxu0 %v1579_v40  ;;  %v2735_v40 = vld [vmem:[%s3645_s12 + $0xb8] sm:$0xff] }
 0x54e   : > { %3149 = vmatprep.subr.msk.mxu0 %vm529_vm1, %v4055_v41 }
 0x54f   : > { %3119 = vmatmul.mubr.msk.f32.gmra.mxu1 %vm529_vm1, %v1352_v33 }
 0x593   : > { %v4060_v42 = vpop.f32.mrf.mxu1 }
 0x595   : > { %v4062_v43 = vpop.f32.mrf.mxu1 }
 0x5c7   : > { %v4064_v44 = vpop.f32.mrf.mxu1 }
 0x5c9   : > { %v4066_v46 = vpop.f32.mrf.mxu1 }
 0x5cb   : > { %v4068_v47 = vpop.f32.mrf.mxu1 }
 0x5cd   : > { %v4070_v49 = vpop.f32.mrf.mxu1 }
 0x5ff   : > { %v4072_v54 = vpop.f32.mrf.mxu1 }
 0x601   : > { %v4074_v57 = vpop.f32.mrf.mxu1 }
 0x603   : > { %v3111_v45 = vpop.f32.mrf.mxu1 }
 0x604   : > { %v1473_v60 = vadd.f32 %v3111_v45, %v2729_v58 }
 0x605   : > { %v1467_v63 = vpop.f32.mrf.mxu1 }
 0x606   : > { %v1468_v0 = vadd.f32 %v2728_v51, %v1467_v63  ;;  %v1509_v1 = vsel %vm667_vm2, %v1473_v60, -inf }
 0x607   : > { %1510 = vmax.xlane.f32.xlu1 %v1509_v1  ;;  %v3114_v4 = vpop.f32.mrf.mxu1 }
 0x608   : > { %v1506_v3 = vsel %vm667_vm2, %v1468_v0, -inf  ;;  %v4089_v33 = vadd.f32 %v3114_v4, %v2731_v10  ;;  %v2734_v4 = vld [vmem:[%s3645_s12 + $0xb0] sm:$0xff] }
 0x609   : > { %1507 = vmax.xlane.f32.xlu0 %v1506_v3  ;;  %v1477_v7 = vpop.f32.mrf.mxu1 }
 0x60a   : > { %v4086_v11 = vadd.f32 %v2730_v8, %v1477_v7  ;;  %v1515_v39 = vsel %vm667_vm2, %v4089_v33, -inf }
 0x60b   : > { %v3117_v9 = vpop.f32.mrf.mxu1 }
 0x60c   : > { %v1512_v2 = vsel %vm667_vm2, %v4086_v11, -inf  ;;  %v4096_v38 = vadd.f32 %v3117_v9, %v2733_v61  ;;  %v1785_v9 = vpop.permute.xlu1 %1784 }
 0x60d   : > { %v1487_v12 = vpop.f32.mrf.mxu1 }
 0x60e   : > { %v4092_v13 = vadd.f32 %v2732_v30, %v1487_v12  ;;  %v1521_v63 = vsel %vm667_vm2, %v4096_v38, -inf  ;;  %v1783_v12 = vpop.permute.xlu0 %1782 }
 0x60f   : > { %v3120_v58 = vpop.f32.mrf.mxu1 }
 0x610   : > { %v1518_v45 = vsel %vm667_vm2, %v4092_v13, -inf  ;;  %v4103_v51 = vadd.f32 %v3120_v58, %v2735_v40  ;;  %v1781_v10 = vpop.permute.xlu1 %1780 }
 0x611   : > { %v1497_v3 = vpop.f32.mrf.mxu1 }
 0x612   : > { %v1527_v1 = vsel %vm667_vm2, %v4103_v51, -inf  ;;  %v4118_v7 = vadd.f32 %v2734_v4, %v1497_v3 }
 0x614   : > { %v1524_v8 = vsel %vm667_vm2, %v4118_v7, -inf }
 0x618   : > { %1776 = vrot.lane.b32.xlu1 %v3697_v25, %s3515_s15 }
 0x61f   : > { %1778 = vrot.lane.b32.xlu0 %v3703_v27, %s3515_s15 }
 0x63c   : > { %1513 = vmax.xlane.f32.xlu1 %v1512_v2 }
 0x63e   : > { %1516 = vmax.xlane.f32.xlu0 %v1515_v39 }
 0x640   : > { %1519 = vmax.xlane.f32.xlu1 %v1518_v45 }
 0x642   : > { %1522 = vmax.xlane.f32.xlu0 %v1521_v63 }
 0x646   : > { %1528 = vmax.xlane.f32.xlu0 %v1527_v1 }
 0x651   : > { %1772 = vrot.lane.b32.xlu1 %v3684_v15, %s3515_s15 }
 0x65c   : > { %1774 = vrot.lane.b32.xlu0 %v3707_v28, %s3515_s15 }
 0x660   : > { %1756 = vrot.lane.b32.xlu0 %v3684_v15, %s3516_s17 }
 0x664   : > { %1760 = vrot.lane.b32.xlu0 %v3697_v25, %s3516_s17 }
 0x668   : > { %1764 = vrot.lane.b32.xlu0 %v3691_v22, %s3516_s17 }
 0x66c   : > { %1768 = vrot.lane.b32.xlu0 %v3699_v26, %s3516_s17 }
 0x670   : > { %2009 = vrot.lane.b32.xlu0 %v3699_v26, %s3517_s18 }
 0x674   : > { %2003 = vrot.lane.b32.xlu0 %v3703_v27, %s3517_s18 }
 0x675   : > { %1525 = vmax.xlane.f32.xlu1 %v1524_v8 }
 0x686   : > { %1758 = vrot.lane.b32.xlu1 %v3707_v28, %s3516_s17 }
 0x68a   : > { %1762 = vrot.lane.b32.xlu1 %v3703_v27, %s3516_s17 }
 0x68e   : > { %1766 = vrot.lane.b32.xlu1 %v3688_v19, %s3516_s17 }
 0x690   : > { %v1511_v30 = vpop.xlane.xlu1 %1510 }
 0x691   : > { %v1531_v61 = vsub.f32 %v1473_v60, %v1511_v30 }
 0x692   : > { %1770 = vrot.lane.b32.xlu1 %v3693_v23, %s3516_s17  ;;  %v1508_v26 = vpop.xlane.xlu0 %1507 }
 0x693   : > { %v1530_v2 = vsub.f32 %v1468_v0, %v1508_v26  ;;  %v1540_v39 = vmul.f32 1.442695, %v1531_v61 }
 0x695   : > { %v1538_v40 = vmul.f32 1.442695, %v1530_v2 }
 0x696   : > { %2011 = vrot.lane.b32.xlu1 %v3693_v23, %s3517_s18 }
 0x697   : > { %3328 = vpow2.f32 %v1538_v40 }
 0x698   : > { %3330 = vpow2.f32 %v1540_v39 }
 0x69a   : > { %2007 = vrot.lane.b32.xlu1 %v3688_v19, %s3517_s18  ;;  %v1779_v19 = vpop.permute.xlu0 %1778 }
 0x69e   : > { %2005 = vrot.lane.b32.xlu1 %v3691_v22, %s3517_s18  ;;  %v1777_v22 = vpop.permute.xlu1 %1776 }
 0x6a2   : > { %2001 = vrot.lane.b32.xlu1 %v3697_v25, %s3517_s18 }
 0x6a4   : > { %v4138_v27 = vpop.eup %3328 }
 0x6a5   : > { %v4140_v60 = vpop.eup %3330  ;;  %3137 = vmatprep.mubr.msk.f32.mxu0 %vm667_vm2, %v4138_v27 }
 0x6a6   : > { %3138 = vmatmul.mubr.msk.f32.vlgmr.msra.gmra.mxu0 %vm667_vm2, %v4140_v60 }
 0x6a7   : > { %3150 = vmatpush3.xpose.msk.msra.mxu0 %vm529_vm1, %v4055_v41 }
 0x6a8   : > { %3151 = vmatprep.subr.msk.mxu0 %vm529_vm1, %v1785_v9 }
 0x6ab   : > { %3152 = vmatpush3.xpose.msk.msra.mxu0 %vm529_vm1, %v1785_v9 }
 0x6ac   : > { %3153 = vmatprep.subr.msk.mxu0 %vm529_vm1, %v1783_v12 }
 0x6af   : > { %3154 = vmatpush3.xpose.msk.msra.mxu0 %vm529_vm1, %v1783_v12 }
 0x6b0   : > { %3155 = vmatprep.subr.msk.mxu0 %vm529_vm1, %v1781_v10 }
 0x6b3   : > { %3156 = vmatpush3.xpose.msk.msra.mxu0 %vm529_vm1, %v1781_v10 }
 0x6b4   : > { %3157 = vmatprep.subr.msk.mxu0 %vm529_vm1, %v1779_v19 }
 0x6b7   : > { %3158 = vmatpush3.xpose.msk.msra.mxu0 %vm529_vm1, %v1779_v19 }
 0x6b8   : > { %3159 = vmatprep.subr.msk.mxu0 %vm529_vm1, %v1777_v22 }
 0x6bb   : > { %3160 = vmatpush3.xpose.msk.msra.mxu0 %vm529_vm1, %v1777_v22 }
 0x6c5   : > { %v1514_v23 = vpop.xlane.xlu1 %1513 }
 0x6c6   : > { %v1532_v25 = vsub.f32 %v4086_v11, %v1514_v23 }
 0x6c7   : > { %v1517_v41 = vpop.xlane.xlu0 %1516 }
 0x6c8   : > { %v1542_v0 = vmul.f32 1.442695, %v1532_v25  ;;  %v1533_v58 = vsub.f32 %v4089_v33, %v1517_v41 }
 0x6c9   : > { %v1520_v45 = vpop.xlane.xlu1 %1519 }
 0x6ca   : > { %3332 = vpow2.f32 %v1542_v0  ;;  %v1544_v63 = vmul.f32 1.442695, %v1533_v58  ;;  %v1534_v1 = vsub.f32 %v4092_v13, %v1520_v45 }
 0x6cb   : > { %v1523_v3 = vpop.xlane.xlu0 %1522 }
 0x6cc   : > { %3334 = vpow2.f32 %v1544_v63  ;;  %v1546_v4 = vmul.f32 1.442695, %v1534_v1  ;;  %v1535_v8 = vsub.f32 %v4096_v38, %v1523_v3 }
 0x6cd   : > { %v1773_v11 = vpop.permute.xlu1 %1772 }
 0x6ce   : > { %3336 = vpow2.f32 %v1546_v4  ;;  %v1548_v9 = vmul.f32 1.442695, %v1535_v8 }
 0x6cf   : > { %v1529_v10 = vpop.xlane.xlu0 %1528 }
 0x6d0   : > { %3338 = vpow2.f32 %v1548_v9  ;;  %v1537_v61 = vsub.f32 %v4103_v51, %v1529_v10 }
 0x6d2   : > { %v1552_v40 = vmul.f32 1.442695, %v1537_v61 }
 0x6d3   : > { %v1775_v12 = vpop.permute.xlu0 %1774 }
 0x6d4   : > { %3161 = vmatprep.subr.msk.mxu0 %vm529_vm1, %v1775_v12 }
 0x6d5   : > { %3162 = vmatpush3.xpose.msk.msra.mxu0 %vm529_vm1, %v1775_v12 }
 0x6d6   : > { %3163 = vmatprep.subr.msk.mxu0 %vm529_vm1, %v1773_v11 }
 0x6d7   : > { %v4165_v33 = vpop.eup %3332  ;;  %v1757_v26 = vpop.permute.xlu0 %1756 }
 0x6d8   : > { %3140 = vmatprep.mubr.msk.f32.mxu0 %vm667_vm2, %v4165_v33 }
 0x6d9   : > { %v4169_v13 = vpop.eup %3334  ;;  %3164 = vmatpush3.xpose.msk.msra.mxu0 %vm529_vm1, %v1773_v11 }
 0x6da   : > { %3141 = vmatmul.mubr.msk.f32.gmra.mxu0 %vm667_vm2, %v4169_v13 }
 0x6db   : > { %v4174_v38 = vpop.eup %3336  ;;  %v1761_v23 = vpop.permute.xlu0 %1760 }
 0x6dc   : > { %3143 = vmatprep.mubr.msk.f32.mxu0 %vm667_vm2, %v4174_v38 }
 0x6dd   : > { %v4178_v30 = vpop.eup %3338 }
 0x6de   : > { %3144 = vmatmul.mubr.msk.f32.gmra.mxu0 %vm667_vm2, %v4178_v30 }
 0x6df   : > { %v1765_v41 = vpop.permute.xlu0 %1764 }
 0x6e3   : > { %v1769_v45 = vpop.permute.xlu0 %1768 }
 0x6fe   : > { %v1526_v2 = vpop.xlane.xlu1 %1525 }
 0x6ff   : > { %v1536_v39 = vsub.f32 %v4118_v7, %v1526_v2  ;;  %v2010_v7 = vpop.permute.xlu0 %2009 }
 0x701   : > { %v1550_v19 = vmul.f32 1.442695, %v1536_v39 }
 0x702   : > { %v1759_v22 = vpop.permute.xlu1 %1758 }
 0x703   : > { %3340 = vpow2.f32 %v1550_v19  ;;  %v2004_v8 = vpop.permute.xlu0 %2003  ;;  %v2761_v19 = vld [vmem:[%s3645_s12 + $0xc8] sm:$0xff] }
 0x704   : > { %3342 = vpow2.f32 %v1552_v40 }
 0x706   : > { %v1763_v25 = vpop.permute.xlu1 %1762 }
 0x70a   : > { %v1767_v0 = vpop.permute.xlu1 %1766 }
 0x70e   : > { %v1771_v58 = vpop.permute.xlu1 %1770 }
 0x710   : > { %v4184_v63 = vpop.eup %3340 }
 0x711   : > { %v4186_v1 = vpop.eup %3342  ;;  %3146 = vmatprep.mubr.msk.f32.mxu0 %vm667_vm2, %v4184_v63 }
 0x712   : > { %v2012_v51 = vpop.permute.xlu1 %2011  ;;  %3147 = vmatmul.mubr.msk.f32.gmra.mxu0 %vm667_vm2, %v4186_v1 }
 0x713   : > { %3165 = vmatprep.mubr.msk.f32.mxu0 %vm529_vm1, %v1757_v26  ;;  %3177 = vmatprep.subr.mxu0 %v2012_v51 }
 0x714   : > { %3225 = vmatprep.subr.mxu1 %v2012_v51 }
 0x715   : > { %3233 = vmatpush3.msra.mxu1 %v2012_v51 }
 0x716   : > { %3226 = vmatprep.subr.mxu1 %v2010_v7  ;;  %v2008_v3 = vpop.permute.xlu1 %2007  ;;  %3166 = vmatmul.mubr.msk.f32.vlgmr.msra.gmra.mxu0 %vm529_vm1, %v1759_v22 }
 0x717   : > { %3178 = vmatpush3.msra.mxu0 %v2012_v51  ;;  %3234 = vmatpush3.msra.mxu1 %v2010_v7 }
 0x718   : > { %3168 = vmatprep.mubr.msk.f32.mxu0 %vm529_vm1, %v1761_v23  ;;  %3179 = vmatprep.subr.mxu0 %v2010_v7  ;;  %v2760_v23 = vld [vmem:[%s3645_s12 + $0xc0] sm:$0xff] }
 0x719   : > { %3227 = vmatprep.subr.mxu1 %v2008_v3  ;;  %3180 = vmatpush3.msra.mxu0 %v2010_v7 }
 0x71a   : > { %3235 = vmatpush3.msra.mxu1 %v2008_v3  ;;  %3181 = vmatprep.subr.mxu0 %v2008_v3  ;;  %v2006_v4 = vpop.permute.xlu1 %2005 }
 0x71b   : > { %3169 = vmatmul.mubr.msk.f32.gmra.mxu0 %vm529_vm1, %v1763_v25  ;;  %3228 = vmatprep.subr.mxu1 %v2006_v4 }
 0x71c   : > { %3182 = vmatpush3.msra.mxu0 %v2008_v3  ;;  %3171 = vmatprep.mubr.msk.f32.mxu0 %vm529_vm1, %v1765_v41 }
 0x71d   : > { %3183 = vmatprep.subr.mxu0 %v2006_v4  ;;  %3236 = vmatpush3.msra.mxu1 %v2006_v4 }
 0x71e   : > { %3184 = vmatpush3.msra.mxu0 %v2006_v4  ;;  %3229 = vmatprep.subr.mxu1 %v2004_v8  ;;  %v2002_v9 = vpop.permute.xlu1 %2001  ;;  %v2762_v4 = vld [vmem:[%s3645_s12 + $0xd0] sm:$0xff] }
 0x71f   : > { %3185 = vmatprep.subr.mxu0 %v2004_v8  ;;  %3172 = vmatmul.mubr.msk.f32.gmra.mxu0 %vm529_vm1, %v1767_v0 }
 0x720   : > { %3186 = vmatpush3.msra.mxu0 %v2004_v8  ;;  %3237 = vmatpush3.msra.mxu1 %v2004_v8 }
 0x721   : > { %3174 = vmatprep.mubr.msk.f32.mxu0 %vm529_vm1, %v1769_v45  ;;  %3187 = vmatprep.subr.mxu0 %v2002_v9  ;;  %v2763_v45 = vld [vmem:[%s3645_s12 + $0xd8] sm:$0xff] }
 0x722   : > { %3230 = vmatprep.subr.mxu1 %v2002_v9  ;;  %3188 = vmatpush3.msra.mxu0 %v2002_v9 }
 0x723   : > { %3238 = vmatpush3.msra.mxu1 %v2002_v9  ;;  %3175 = vmatmul.mubr.msk.f32.gmra.mxu0 %vm529_vm1, %v1771_v58 }
 0x766   : > { %v4200_v10 = vpop.f32.mrf.mxu0 }
 0x768   : > { %v4202_v12 = vpop.f32.mrf.mxu0 }
 0x79a   : > { %v4204_v11 = vpop.f32.mrf.mxu0 }
 0x79c   : > { %v4206_v61 = vpop.f32.mrf.mxu0 }
 0x79e   : > { %v4208_v26 = vpop.f32.mrf.mxu0 }
 0x7a0   : > { %v4210_v2 = vpop.f32.mrf.mxu0 }
 0x7d2   : > { %v4212_v39 = vpop.f32.mrf.mxu0 }
 0x7d4   : > { %v4214_v40 = vpop.f32.mrf.mxu0 }
 0x7d6   : > { %v3167_v22 = vpop.f32.mrf.mxu0 }
 0x7d7   : > { %v4218_v25 = vadd.f32 %v3167_v22, %v2761_v19 }
 0x7d8   : > { %v1886_v41 = vpop.f32.mrf.mxu0 }
 0x7d9   : > { %v4220_v0 = vadd.f32 %v2760_v23, %v1886_v41  ;;  %v1928_v58 = vsel %vm667_vm2, %v4218_v25, -inf  ;;  %v2764_v23 = vld [vmem:[%s3645_s12 + $0xe0] sm:$0xff]  ;;  %v2765_v41 = vld [vmem:[%s3645_s12 + $0xe8] sm:$0xff] }
 0x7da   : > { %1929 = vmax.xlane.f32.xlu1 %v1928_v58 }
 0x7db   : > { %v3170_v51 = vpop.f32.mrf.mxu0  ;;  %v1925_v7 = vsel %vm667_vm2, %v4220_v0, -inf }
 0x7dc   : > { %v4227_v3 = vadd.f32 %v3170_v51, %v2763_v45  ;;  %1926 = vmax.xlane.f32.xlu0 %v1925_v7  ;;  %v2766_v7 = vld [vmem:[%s3645_s12 + $0xf0] sm:$0xff]  ;;  %s3518_s12 = smov 8  }
 0x7dd   : > { %v1896_v8 = vpop.f32.mrf.mxu0 }
 0x7de   : > { %v4230_v9 = vadd.f32 %v2762_v4, %v1896_v8  ;;  %v1934_v22 = vsel %vm667_vm2, %v4227_v3, -inf }
 0x7df   : > { %v3173_v19 = vpop.f32.mrf.mxu0 }
 0x7e0   : > { %1935 = vmax.xlane.f32.xlu0 %v1934_v22  ;;  %v4238_v29 = vadd.f32 %v3173_v19, %v2765_v41  ;;  %v1931_v51 = vsel %vm667_vm2, %v4230_v9, -inf }
 0x7e1   : > { %v1906_v58 = vpop.f32.mrf.mxu0 }
 0x7e2   : > { %v4236_v24 = vadd.f32 %v2764_v23, %v1906_v58  ;;  %v1940_v19 = vsel %vm667_vm2, %v4238_v29, -inf  ;;  %v1135_v58 = vsel %vm667_vm2, %v3990_v34, 0.0  ;;  %v1147_v34 = vsel %vm667_vm2, %v4030_v56, 0.0 }
 0x7e3   : > { %v3176_v45 = vpop.f32.mrf.mxu0  ;;  %v1150_v56 = vsel %vm667_vm2, %v4034_v62, 0.0  ;;  %v1575_v62 = vsel %vm667_vm2, %v4186_v1, 0.0 }
 0x7e4   : > { %1932 = vmax.xlane.f32.xlu0 %v1931_v51  ;;  %v1937_v4 = vsel %vm667_vm2, %v4236_v24, -inf  ;;  %v4248_v22 = vadd.f32 %v3176_v45, %v2767_v20  ;;  %v1138_v20 = vsel %vm667_vm2, %v3992_v35, 0.0  ;;  %v1141_v45 = vsel %vm667_vm2, %v4021_v48, 0.0 }
 0x7e5   : > { %1938 = vmax.xlane.f32.xlu1 %v1937_v4  ;;  %v1916_v8 = vpop.f32.mrf.mxu0  ;;  %v1554_v51 = vsel %vm667_vm2, %v4138_v27, 0.0  ;;  %v1144_v35 = vsel %vm667_vm2, %v4025_v59, 0.0  ;;  %v1566_v48 = vsel %vm667_vm2, %v4174_v38, 0.0  ;;  %v1563_v27 = vsel %vm667_vm2, %v4169_v13, 0.0 }
 0x7e6   : > { %v4246_v21 = vadd.f32 %v2766_v7, %v1916_v8  ;;  %v1946_v41 = vsel %vm667_vm2, %v4248_v22, -inf  ;;  %v1572_v59 = vsel %vm667_vm2, %v4184_v63, 0.0  ;;  %v716_v13 = vsel %vm667_vm2, %v3832_v31, 0.0 }
 0x7e8   : > { %1941 = vmax.xlane.f32.xlu0 %v1940_v19  ;;  %v1943_v23 = vsel %vm667_vm2, %v4246_v21, -inf }
 0x7e9   : > { %1944 = vmax.xlane.f32.xlu1 %v1943_v23 }
 0x7ec   : > { %1947 = vmax.xlane.f32.xlu0 %v1946_v41 }
 0x7fa   : > { %1997 = vrot.lane.b32.xlu1 %v3684_v15, %s3517_s18  ;;  %v1560_v15 = vsel %vm667_vm2, %v4165_v33, 0.0  ;;  %v1569_v33 = vsel %vm667_vm2, %v4178_v30, 0.0 }
 0x802   : > { %1999 = vrot.lane.b32.xlu0 %v3707_v28, %s3517_s18  ;;  %v1557_v28 = vsel %vm667_vm2, %v4140_v60, 0.0  ;;  %v1153_v60 = vsel %vm667_vm2, %v4040_v36, 0.0  ;;  %v1156_v36 = vsel %vm667_vm2, %v4042_v37, 0.0 }
 0x81e   : > { %1139 = vadd.xlane.f32.xlu1 %v1138_v20 }
 0x821   : > { %1136 = vadd.xlane.f32.xlu0 %v1135_v58 }
 0x822   : > { %1142 = vadd.xlane.f32.xlu1 %v1141_v45 }
 0x825   : > { %1555 = vadd.xlane.f32.xlu0 %v1554_v51 }
 0x826   : > { %1561 = vadd.xlane.f32.xlu1 %v1560_v15 }
 0x829   : > { %1558 = vadd.xlane.f32.xlu0 %v1557_v28 }
 0x82a   : > { %1148 = vadd.xlane.f32.xlu1 %v1147_v34 }
 0x82d   : > { %1145 = vadd.xlane.f32.xlu0 %v1144_v35 }
 0x82e   : > { %1567 = vadd.xlane.f32.xlu1 %v1566_v48 }
 0x831   : > { %1564 = vadd.xlane.f32.xlu0 %v1563_v27 }
 0x832   : > { %1154 = vadd.xlane.f32.xlu1 %v1153_v60 }
 0x835   : > { %1151 = vadd.xlane.f32.xlu0 %v1150_v56 }
 0x836   : > { %1573 = vadd.xlane.f32.xlu1 %v1572_v59 }
 0x839   : > { %1570 = vadd.xlane.f32.xlu0 %v1569_v33 }
 0x83a   : > { %717 = vadd.xlane.f32.xlu1 %v716_v13 }
 0x83d   : > { %1157 = vadd.xlane.f32.xlu0 %v1156_v36 }
 0x841   : > { %1576 = vadd.xlane.f32.xlu0 %v1575_v62 }
 0x863   : > { %v1930_v38 = vpop.xlane.xlu1 %1929 }
 0x864   : > { %v1950_v63 = vsub.f32 %v4218_v25, %v1930_v38 }
 0x865   : > { %v1927_v7 = vpop.xlane.xlu0 %1926 }
 0x866   : > { %v1959_v4 = vmul.f32 1.442695, %v1950_v63  ;;  %v1949_v30 = vsub.f32 %v4220_v0, %v1927_v7 }
 0x868   : > { %3344 = vpow2.f32 %v1959_v4  ;;  %v1957_v8 = vmul.f32 1.442695, %v1949_v30  ;;  %v722_v4 = vsel %vm667_vm2, %v3865_v50, 0.0  ;;  %v734_v50 = vsel %vm667_vm2, %v3884_v5, 0.0 }
 0x869   : > { %v1936_v19 = vpop.xlane.xlu0 %1935 }
 0x86a   : > { %3346 = vpow2.f32 %v1957_v8  ;;  %v1952_v31 = vsub.f32 %v4227_v3, %v1936_v19  ;;  %v728_v8 = vsel %vm667_vm2, %v3874_v53, 0.0  ;;  %v719_v19 = vsel %vm667_vm2, %v3834_v32, 0.0 }
 0x86b   : > { %v737_v32 = vsel %vm667_vm2, %v3886_v6, 0.0 }
 0x86c   : > { %v1963_v23 = vmul.f32 1.442695, %v1952_v31 }
 0x86d   : > { %v1933_v37 = vpop.xlane.xlu0 %1932 }
 0x86e   : > { %3348 = vpow2.f32 %v1963_v23  ;;  %v1939_v41 = vpop.xlane.xlu1 %1938  ;;  %v1951_v1 = vsub.f32 %v4230_v9, %v1933_v37  ;;  %v725_v23 = vsel %vm667_vm2, %v3869_v52, 0.0  ;;  %v731_v37 = vsel %vm667_vm2, %v3878_v55, 0.0 }
 0x86f   : > { %v1953_v20 = vsub.f32 %v4236_v24, %v1939_v41 }
 0x870   : > { %v1961_v58 = vmul.f32 1.442695, %v1951_v1 }
 0x871   : > { %v1965_v25 = vmul.f32 1.442695, %v1953_v20  ;;  %v1942_v45 = vpop.xlane.xlu0 %1941 }
 0x872   : > { %3350 = vpow2.f32 %v1961_v58  ;;  %v1945_v51 = vpop.xlane.xlu1 %1944  ;;  %v1954_v0 = vsub.f32 %v4238_v29, %v1942_v45 }
 0x873   : > { %v1955_v15 = vsub.f32 %v4246_v21, %v1945_v51  ;;  %3352 = vpow2.f32 %v1965_v25 }
 0x874   : > { %v1967_v28 = vmul.f32 1.442695, %v1954_v0 }
 0x875   : > { %v3345_v3 = vpop.eup %3344  ;;  %v1969_v34 = vmul.f32 1.442695, %v1955_v15  ;;  %v1948_v35 = vpop.xlane.xlu0 %1947 }
 0x876   : > { %3354 = vpow2.f32 %v1967_v28  ;;  %v1956_v48 = vsub.f32 %v4248_v22, %v1948_v35  ;;  %v1976_v9 = vsel %vm667_vm2, %v3345_v3, 0.0  ;;  %v1998_v56 = vpop.permute.xlu1 %1997 }
 0x877   : > { %v3347_v24 = vpop.eup %3346  ;;  %1977 = vadd.xlane.f32.xlu0 %v1976_v9  ;;  %3356 = vpow2.f32 %v1969_v34 }
 0x878   : > { %v1971_v27 = vmul.f32 1.442695, %v1956_v48  ;;  %3193 = vmatprep.mubr.msk.f32.mxu0 %vm667_vm2, %v3347_v24  ;;  %v1973_v60 = vsel %vm667_vm2, %v3347_v24, 0.0 }
 0x879   : > { %1974 = vadd.xlane.f32.xlu1 %v1973_v60  ;;  %v2000_v21 = vpop.permute.xlu0 %1999 }
 0x87a   : > { %3358 = vpow2.f32 %v1971_v27  ;;  %3189 = vmatprep.subr.mxu0 %v2000_v21  ;;  %3231 = vmatprep.subr.mxu1 %v2000_v21 }
 0x87b   : > { %v3349_v29 = vpop.eup %3348  ;;  %3190 = vmatpush3.msra.mxu0 %v2000_v21  ;;  %3239 = vmatpush3.msra.mxu1 %v2000_v21 }
 0x87c   : > { %3191 = vmatprep.subr.mxu0 %v1998_v56  ;;  %3232 = vmatprep.subr.mxu1 %v1998_v56  ;;  %v1982_v22 = vsel %vm667_vm2, %v3349_v29, 0.0 }
 0x87d   : > { %1983 = vadd.xlane.f32.xlu0 %v1982_v22  ;;  %3192 = vmatpush3.msra.mxu0 %v1998_v56 }
 0x87e   : > { %3240 = vmatpush3.msra.mxu1 %v1998_v56  ;;  %3194 = vmatmul.mubr.msk.f32.vlgmr.msra.gmra.mxu0 %vm667_vm2, %v3345_v3 }
 0x87f   : > { %v3351_v59 = vpop.eup %3350 }
 0x880   : > { %3196 = vmatprep.mubr.msk.f32.mxu1 %vm667_vm2, %v3351_v59  ;;  %v1979_v33 = vsel %vm667_vm2, %v3351_v59, 0.0  ;;  %v3353_v13 = vpop.eup %3352 }
 0x881   : > { %1980 = vadd.xlane.f32.xlu1 %v1979_v33  ;;  %3197 = vmatmul.mubr.msk.f32.vlgmr.msra.gmra.mxu1 %vm667_vm2, %v3349_v29  ;;  %v1985_v62 = vsel %vm667_vm2, %v3353_v13, 0.0 }
 0x882   : > { %3199 = vmatprep.mubr.msk.f32.mxu1 %vm667_vm2, %v3353_v13 }
 0x883   : > { %v3355_v36 = vpop.eup %3354 }
 0x884   : > { %v1988_v38 = vsel %vm667_vm2, %v3355_v36, 0.0  ;;  %v3357_v63 = vpop.eup %3356 }
 0x885   : > { %1986 = vadd.xlane.f32.xlu1 %v1985_v62  ;;  %1989 = vadd.xlane.f32.xlu0 %v1988_v38  ;;  %v1991_v31 = vsel %vm667_vm2, %v3357_v63, 0.0 }
 0x886   : > { %3200 = vmatmul.mubr.msk.f32.gmra.mxu1 %vm667_vm2, %v3355_v36 }
 0x887   : > { %v3359_v7 = vpop.eup %3358  ;;  %3202 = vmatprep.mubr.msk.f32.mxu1 %vm667_vm2, %v3357_v63 }
 0x888   : > { %v1994_v30 = vsel %vm667_vm2, %v3359_v7, 0.0 }
 0x889   : > { %723 = vadd.xlane.f32.xlu1 %v722_v4  ;;  %1995 = vadd.xlane.f32.xlu0 %v1994_v30 }
 0x88a   : > { %3203 = vmatmul.mubr.msk.f32.gmra.mxu1 %vm667_vm2, %v3359_v7 }
 0x88d   : > { %729 = vadd.xlane.f32.xlu1 %v728_v8  ;;  %720 = vadd.xlane.f32.xlu0 %v719_v19 }
 0x891   : > { %1992 = vadd.xlane.f32.xlu1 %v1991_v31  ;;  %726 = vadd.xlane.f32.xlu0 %v725_v23 }
 0x895   : > { %735 = vadd.xlane.f32.xlu1 %v734_v50  ;;  %732 = vadd.xlane.f32.xlu0 %v731_v37 }
 0x899   : > { %738 = vadd.xlane.f32.xlu0 %v737_v32 }
 0x8a7   : > { %v1140_v53 = vpop.xlane.xlu1 %1139 }
 0x8a8   : > { %3360 = vrcp.f32 %v1140_v53 }
 0x8aa   : > { %v1137_v41 = vpop.xlane.xlu0 %1136 }
 0x8ab   : > { %v1143_v1 = vpop.xlane.xlu1 %1142  ;;  %3362 = vrcp.f32 %v1137_v41 }
 0x8ac   : > { %3364 = vrcp.f32 %v1143_v1 }
 0x8ae   : > { %v1556_v52 = vpop.xlane.xlu0 %1555 }
 0x8af   : > { %v1562_v20 = vpop.xlane.xlu1 %1561  ;;  %3366 = vrcp.f32 %v1556_v52 }
 0x8b0   : > { %3368 = vrcp.f32 %v1562_v20 }
 0x8b2   : > { %v1559_v5 = vpop.xlane.xlu0 %1558 }
 0x8b3   : > { %v1149_v58 = vpop.xlane.xlu1 %1148  ;;  %3370 = vrcp.f32 %v1559_v5 }
 0x8b4   : > { %3372 = vrcp.f32 %v1149_v58 }
 0x8b5   : > { %v3361_v55 = vpop.eup %3360 }
 0x8b6   : > { %v1146_v25 = vpop.xlane.xlu0 %1145  ;;  %v1321_v45 = vmul.f32 %v3361_v55, %v4060_v42 }
 0x8b7   : > { %v1568_v6 = vpop.xlane.xlu1 %1567  ;;  %3374 = vrcp.f32 %v1146_v25 }
 0x8b8   : > { %v3363_v51 = vpop.eup %3362  ;;  %3376 = vrcp.f32 %v1568_v6  ;;  %2176 = vrot.lane.b32.xlu0 %v1321_v45, %s3518_s12 }
 0x8b9   : > { %v3365_v0 = vpop.eup %3364  ;;  %v1320_v15 = vmul.f32 %v3363_v51, %v4062_v43 }
 0x8ba   : > { %v1565_v28 = vpop.xlane.xlu0 %1564  ;;  %v1322_v3 = vmul.f32 %v3365_v0, %v4066_v46 }
 0x8bb   : > { %v1155_v34 = vpop.xlane.xlu1 %1154  ;;  %3378 = vrcp.f32 %v1565_v28  ;;  %2174 = vrot.lane.b32.xlu1 %v1320_v15, %s3518_s12 }
 0x8bc   : > { %v3367_v35 = vpop.eup %3366  ;;  %3380 = vrcp.f32 %v1155_v34  ;;  %2178 = vrot.lane.b32.xlu0 %v1322_v3, %s3518_s12 }
 0x8bd   : > { %v3369_v42 = vpop.eup %3368  ;;  %v1739_v48 = vmul.f32 %v3367_v35, %v4202_v12 }
 0x8be   : > { %v1152_v9 = vpop.xlane.xlu0 %1151  ;;  %v1741_v24 = vmul.f32 %v3369_v42, %v4206_v61 }
 0x8bf   : > { %v1574_v27 = vpop.xlane.xlu1 %1573  ;;  %3382 = vrcp.f32 %v1152_v9  ;;  %2206 = vrot.lane.b32.xlu1 %v1739_v48, %s3519_s19 }
 0x8c0   : > { %v3371_v43 = vpop.eup %3370  ;;  %3384 = vrcp.f32 %v1574_v27  ;;  %2210 = vrot.lane.b32.xlu0 %v1741_v24, %s3519_s19 }
 0x8c1   : > { %v3373_v46 = vpop.eup %3372  ;;  %v1740_v60 = vmul.f32 %v3371_v43, %v4200_v10 }
 0x8c2   : > { %v1571_v21 = vpop.xlane.xlu0 %1570  ;;  %v1324_v29 = vmul.f32 %v3373_v46, %v4070_v49 }
 0x8c3   : > { %3386 = vrcp.f32 %v1571_v21  ;;  %2208 = vrot.lane.b32.xlu1 %v1740_v60, %s3519_s19 }
 0x8c4   : > { %v3375_v12 = vpop.eup %3374  ;;  %2182 = vrot.lane.b32.xlu0 %v1324_v29, %s3518_s12 }
 0x8c5   : > { %v3377_v61 = vpop.eup %3376  ;;  %v1323_v56 = vmul.f32 %v3375_v12, %v4064_v44 }
 0x8c6   : > { %v1158_v22 = vpop.xlane.xlu0 %1157  ;;  %v1743_v59 = vmul.f32 %v3377_v61, %v4210_v2 }
 0x8c7   : > { %3388 = vrcp.f32 %v1158_v22  ;;  %2180 = vrot.lane.b32.xlu1 %v1323_v56, %s3518_s12 }
 0x8c8   : > { %v3379_v33 = vpop.eup %3378  ;;  %2214 = vrot.lane.b32.xlu0 %v1743_v59, %s3519_s19 }
 0x8c9   : > { %v3381_v10 = vpop.eup %3380  ;;  %v1742_v49 = vmul.f32 %v3379_v33, %v4204_v11 }
 0x8ca   : > { %v1577_v13 = vpop.xlane.xlu0 %1576  ;;  %v1326_v36 = vmul.f32 %v3381_v10, %v4074_v57 }
 0x8cb   : > { %3390 = vrcp.f32 %v1577_v13  ;;  %2212 = vrot.lane.b32.xlu1 %v1742_v49, %s3519_s19 }
 0x8cc   : > { %v3383_v62 = vpop.eup %3382  ;;  %2186 = vrot.lane.b32.xlu0 %v1326_v36, %s3518_s12 }
 0x8cd   : > { %v3385_v44 = vpop.eup %3384  ;;  %v1325_v2 = vmul.f32 %v3383_v62, %v4068_v47  ;;  %v4364_v47 = vpop.xlane.xlu1 %717 }
 0x8ce   : > { %v1745_v38 = vmul.f32 %v3385_v44, %v4214_v40 }
 0x8cf   : > { %2184 = vrot.lane.b32.xlu1 %v1325_v2, %s3518_s12 }
 0x8d0   : > { %v3387_v63 = vpop.eup %3386  ;;  %2218 = vrot.lane.b32.xlu0 %v1745_v38, %s3519_s19 }
 0x8d1   : > { %v1744_v11 = vmul.f32 %v3387_v63, %v4208_v26 }
 0x8d3   : > { %2216 = vrot.lane.b32.xlu1 %v1744_v11, %s3519_s19 }
 0x8d4   : > { %v3389_v57 = vpop.eup %3388 }
 0x8d5   : > { %v1327_v7 = vmul.f32 %v3389_v57, %v4072_v54 }
 0x8d7   : > { %2188 = vrot.lane.b32.xlu1 %v1327_v7, %s3518_s12 }
 0x8d8   : > { %v3391_v4 = vpop.eup %3390 }
 0x8d9   : > { %v1746_v30 = vmul.f32 %v3391_v4, %v4212_v39 }
 0x8db   : > { %2220 = vrot.lane.b32.xlu1 %v1746_v30, %s3519_s19 }
 0x900   : > { %v1978_v31 = vpop.xlane.xlu0 %1977 }
 0x901   : > { %3392 = vrcp.f32 %v1978_v31 }
 0x902   : > { %v1975_v40 = vpop.xlane.xlu1 %1974 }
 0x903   : > { %3394 = vrcp.f32 %v1975_v40 }
 0x906   : > { %v1984_v23 = vpop.xlane.xlu0 %1983 }
 0x907   : > { %3396 = vrcp.f32 %v1984_v23 }
 0x90a   : > { %v1981_v8 = vpop.xlane.xlu1 %1980 }
 0x90b   : > { %3398 = vrcp.f32 %v1981_v8 }
 0x90e   : > { %v1987_v19 = vpop.xlane.xlu1 %1986  ;;  %v1990_v54 = vpop.xlane.xlu0 %1989 }
 0x90f   : > { %3400 = vrcp.f32 %v1990_v54  ;;  %v3393_v32 = vpop.eup %3392 }
 0x910   : > { %3402 = vrcp.f32 %v1987_v19  ;;  %v3395_v1 = vpop.eup %3394 }
 0x912   : > { %v4366_v26 = vpop.xlane.xlu1 %723  ;;  %v1996_v37 = vpop.xlane.xlu0 %1995 }
 0x913   : > { %3404 = vrcp.f32 %v1996_v37 }
 0x914   : > { %v3397_v20 = vpop.eup %3396 }
 0x916   : > { %v730_v50 = vpop.xlane.xlu1 %729  ;;  %v721_v43 = vpop.xlane.xlu0 %720 }
 0x918   : > { %v3399_v25 = vpop.eup %3398 }
 0x91a   : > { %v1993_v39 = vpop.xlane.xlu1 %1992  ;;  %v727_v60 = vpop.xlane.xlu0 %726 }
 0x91b   : > { %3406 = vrcp.f32 %v1993_v39 }
 0x91c   : > { %v3401_v51 = vpop.eup %3400  ;;  %3408 = vrcp.f32 %v721_v43 }
 0x91d   : > { %v3403_v28 = vpop.eup %3402  ;;  %3410 = vrcp.f32 %v4364_v47 }
 0x91e   : > { %v736_v46 = vpop.xlane.xlu1 %735  ;;  %v733_v29 = vpop.xlane.xlu0 %732  ;;  %3412 = vrcp.f32 %v4366_v26 }
 0x91f   : > { %3414 = vrcp.f32 %v727_v60 }
 0x920   : > { %v3405_v35 = vpop.eup %3404  ;;  %3416 = vrcp.f32 %v730_v50 }
 0x921   : > { %3418 = vrcp.f32 %v733_v29  ;;  %v4537_v29 = vld [vmem:[#allocation7_spill] sm:$0xff] }
 0x922   : > { %v739_v61 = vpop.xlane.xlu0 %738  ;;  %3420 = vrcp.f32 %v736_v46 }
 0x923   : > { %3422 = vrcp.f32 %v739_v61 }
 0x928   : > { %v3407_v9 = vpop.eup %3406 }
 0x929   : > { %v3409_v63 = vpop.eup %3408 }
 0x92a   : > { %v2177_v22 = vpop.permute.xlu0 %2176  ;;  %v3411_v11 = vpop.eup %3410  ;;  %v902_v7 = vmul.f32 %v3409_v63, %v3904_v14 }
 0x92b   : > { %v901_v47 = vmul.f32 %v3411_v11, %v3906_v16  ;;  %v3413_v40 = vpop.eup %3412 }
 0x92c   : > { %v2263_v30 = vsel %vm529_vm1, %v902_v7, %v2177_v22  ;;  %v3415_v26 = vpop.eup %3414  ;;  %v903_v37 = vmul.f32 %v3413_v40, %v3910_v18 }
 0x92d   : > { %v2175_v21 = vpop.permute.xlu1 %2174  ;;  %v3417_v16 = vpop.eup %3416 }
 0x92e   : > { %v2179_v33 = vpop.permute.xlu0 %2178  ;;  %v2262_v31 = vsel %vm529_vm1, %v901_v47, %v2175_v21 }
 0x931   : > { %v2207_v12 = vpop.permute.xlu1 %2206 }
 0x932   : > { %v2211_v49 = vpop.permute.xlu0 %2210  ;;  %v2271_v54 = vsel %vm2270_vm4, %v2262_v31, %v2207_v12 }
 0x935   : > { %v2209_v56 = vpop.permute.xlu1 %2208 }
 0x936   : > { %v2183_v36 = vpop.permute.xlu0 %2182  ;;  %v2272_v8 = vsel %vm2270_vm4, %v2263_v30, %v2209_v56 }
 0x939   : > { %v2181_v59 = vpop.permute.xlu1 %2180 }
 0x93a   : > { %v2215_v44 = vpop.permute.xlu0 %2214 }
 0x93d   : > { %v2213_v10 = vpop.permute.xlu1 %2212 }
 0x93e   : > { %v3195_v53 = vpop.f32.mrf.mxu0  ;;  %v2187_v38 = vpop.permute.xlu0 %2186 }
 0x93f   : > { %v2159_v41 = vmul.f32 %v3393_v32, %v3195_v53 }
 0x940   : > { %v2111_v52 = vpop.f32.mrf.mxu0 }
 0x941   : > { %v2158_v5 = vmul.f32 %v3395_v1, %v2111_v52  ;;  %v3198_v58 = vpop.f32.mrf.mxu1  ;;  %2240 = vrot.lane.b32.xlu1 %v2159_v41, %s3520_s21  ;;  %v2185_v13 = vpop.permute.xlu1 %2184  ;;  %v2264_v41 = vsel %vm529_vm1, %v903_v37, %v2179_v33  ;;  %v904_v1 = vmul.f32 %v3415_v26, %v3908_v17  ;;  %v4535_v17 = vld [vmem:[#allocation5_spill] sm:$0xff] }
 0x942   : > { %v2161_v55 = vmul.f32 %v3397_v20, %v3198_v58  ;;  %v2219_v4 = vpop.permute.xlu0 %2218  ;;  %v3419_v52 = vpop.eup %3418  ;;  %v2273_v20 = vsel %vm2270_vm4, %v2264_v41, %v2211_v49  ;;  %v4534_v58 = vld [vmem:[#allocation6_spill] sm:$0xff] }
 0x943   : > { %v2121_v45 = vpop.f32.mrf.mxu1  ;;  %2238 = vrot.lane.b32.xlu0 %v2158_v5, %s3520_s21  ;;  %v2265_v18 = vsel %vm529_vm1, %v904_v1, %v2181_v59 }
 0x944   : > { %v2160_v6 = vmul.f32 %v3399_v25, %v2121_v45  ;;  %v3421_v45 = vpop.eup %3420 }
 0x945   : > { %2244 = vrot.lane.b32.xlu1 %v2161_v55, %s3520_s21  ;;  %v2217_v62 = vpop.permute.xlu1 %2216  ;;  %v905_v55 = vmul.f32 %v3417_v16, %v4534_v58 }
 0x946   : > { %v3201_v0 = vpop.f32.mrf.mxu1 }
 0x947   : > { %v2163_v15 = vmul.f32 %v3401_v51, %v3201_v0  ;;  %2242 = vrot.lane.b32.xlu0 %v2160_v6, %s3520_s21  ;;  %v2274_v6 = vsel %vm2270_vm4, %v2265_v18, %v2213_v10 }
 0x948   : > { %v2131_v3 = vpop.f32.mrf.mxu1 }
 0x949   : > { %v2162_v34 = vmul.f32 %v3403_v28, %v2131_v3  ;;  %2248 = vrot.lane.b32.xlu1 %v2163_v15, %s3520_s21  ;;  %v4370_v2 = vpop.permute.xlu1 %2188  ;;  %v2266_v15 = vsel %vm529_vm1, %v905_v55, %v2183_v36  ;;  %v906_v28 = vmul.f32 %v3419_v52, %v4535_v17 }
 0x94a   : > { %v3204_v42 = vpop.f32.mrf.mxu1 }
 0x94b   : > { %v2165_v48 = vmul.f32 %v3405_v35, %v3204_v42  ;;  %2246 = vrot.lane.b32.xlu0 %v2162_v34, %s3520_s21  ;;  %v3423_v34 = vpop.eup %3422  ;;  %v2275_v35 = vsel %vm2270_vm4, %v2266_v15, %v2215_v44 }
 0x94c   : > { %v2141_v24 = vpop.f32.mrf.mxu1  ;;  %v908_v12 = vmul.f32 %v3423_v34, %v4537_v29  ;;  %v2426_v34 = vld [vmem:[%s4522_s6 + $0x18] sm:$0xff] }
 0x94d   : > { %v2164_v27 = vmul.f32 %v3407_v9, %v2141_v24  ;;  %2252 = vrot.lane.b32.xlu1 %v2165_v48, %s3520_s21  ;;  %v2221_v57 = vpop.permute.xlu1 %2220  ;;  %v4536_v48 = vld [vmem:[#allocation8_spill] sm:$0xff]  ;;  %v2267_v24 = vsel %vm529_vm1, %v906_v28, %v2185_v13  ;;  %3205 = vmatprep.subr.mxu1 %v2426_v34 }
 0x94e   : > { %v907_v9 = vmul.f32 %v3421_v45, %v4536_v48  ;;  %v2276_v43 = vsel %vm2270_vm4, %v2267_v24, %v2217_v62  ;;  %v2269_v33 = vsel %vm529_vm1, %v908_v12, %v4370_v2  ;;  %3206 = vmatpush3.msra.mxu1 %v2426_v34  ;;  %v2423_v48 = vld [vmem:[%s4522_s6] sm:$0xff] }
 0x94f   : > { %2250 = vrot.lane.b32.xlu0 %v2164_v27, %s3520_s21  ;;  %v2278_v49 = vsel %vm2270_vm4, %v2269_v33, %v2221_v57 }
 0x950   : > { %v2268_v21 = vsel %vm529_vm1, %v907_v9, %v2187_v38 }
 0x951   : > { %v2277_v56 = vsel %vm2270_vm4, %v2268_v21, %v2219_v4 }
 0x9b3   : > { %v2241_v19 = vpop.permute.xlu1 %2240 }
 0x9b4   : > { %v2281_v23 = vsel %vm2279_vm3, %v2272_v8, %v2241_v19 }
 0x9b5   : > { %v2239_v50 = vpop.permute.xlu0 %2238  ;;  %v2291_v14 = vsel %vm367_vm0, %v2281_v23, 0.0 }
 0x9b6   : > { %v2280_v39 = vsel %vm2279_vm3, %v2271_v54, %v2239_v50  ;;  %2292 = vadd.xlane.f32.xlu1 %v2291_v14 }
 0x9b7   : > { %v2245_v32 = vpop.permute.xlu1 %2244  ;;  %v2288_v53 = vsel %vm367_vm0, %v2280_v39, 0.0 }
 0x9b8   : > { %2289 = vadd.xlane.f32.xlu0 %v2288_v53  ;;  %v2283_v3 = vsel %vm2279_vm3, %v2274_v6, %v2245_v32 }
 0x9b9   : > { %v2243_v5 = vpop.permute.xlu0 %2242  ;;  %v2297_v46 = vsel %vm367_vm0, %v2283_v3, 0.0 }
 0x9ba   : > { %v2282_v25 = vsel %vm2279_vm3, %v2273_v20, %v2243_v5 }
 0x9bb   : > { %v2249_v51 = vpop.permute.xlu1 %2248  ;;  %v2294_v0 = vsel %vm367_vm0, %v2282_v25, 0.0 }
 0x9bc   : > { %2295 = vadd.xlane.f32.xlu0 %v2294_v0  ;;  %v2285_v61 = vsel %vm2279_vm3, %v2276_v43, %v2249_v51 }
 0x9bd   : > { %v2247_v42 = vpop.permute.xlu0 %2246  ;;  %v2303_v13 = vsel %vm367_vm0, %v2285_v61, 0.0 }
 0x9be   : > { %v2284_v27 = vsel %vm2279_vm3, %v2275_v35, %v2247_v42  ;;  %v2425_v35 = vld [vmem:[%s4522_s6 + $0x10] sm:$0xff]  ;;  %v2424_v42 = vld [vmem:[%s4522_s6 + $0x8] sm:$0xff] }
 0x9bf   : > { %v2300_v60 = vsel %vm367_vm0, %v2284_v27, 0.0  ;;  %v2253_v22 = vpop.permute.xlu1 %2252  ;;  %3207 = vmatprep.subr.mxu1 %v2425_v35 }
 0x9c0   : > { %2298 = vadd.xlane.f32.xlu0 %v2297_v46  ;;  %2301 = vadd.xlane.f32.xlu1 %v2300_v60  ;;  %v2287_v62 = vsel %vm2279_vm3, %v2278_v49, %v2253_v22 }
 0x9c1   : > { %v2251_v59 = vpop.permute.xlu0 %2250  ;;  %v2309_v44 = vsel %vm367_vm0, %v2287_v62, 0.0  ;;  %3208 = vmatpush3.msra.mxu1 %v2425_v35 }
 0x9c2   : > { %v2286_v10 = vsel %vm2279_vm3, %v2277_v56, %v2251_v59  ;;  %3209 = vmatprep.subr.mxu1 %v2424_v42 }
 0x9c3   : > { %v2306_v36 = vsel %vm367_vm0, %v2286_v10, 0.0  ;;  %3210 = vmatpush3.msra.mxu1 %v2424_v42 }
 0x9c4   : > { %2304 = vadd.xlane.f32.xlu0 %v2303_v13  ;;  %2307 = vadd.xlane.f32.xlu1 %v2306_v36 }
 0x9c5   : > { %3211 = vmatprep.subr.mxu1 %v2423_v48 }
 0x9c6   : > { %3212 = vmatpush3.msra.mxu1 %v2423_v48 }
 0x9c8   : > { %2310 = vadd.xlane.f32.xlu0 %v2309_v44 }
 0xa3f   : > { %v2293_v38 = vpop.xlane.xlu1 %2292 }
 0xa40   : > { %v2314_v63 = vmul.f32 0.03125, %v2293_v38 }
 0xa41   : > { %v2290_v11 = vpop.xlane.xlu0 %2289 }
 0xa42   : > { %v4413_v7 = vsub.f32 %v2281_v23, %v2314_v63  ;;  %v2313_v2 = vmul.f32 0.03125, %v2290_v11 }
 0xa44   : > { %v4415_v4 = vsub.f32 %v2280_v39, %v2313_v2  ;;  %v2330_v57 = vmul.f32 %v4413_v7, %v4413_v7  ;;  %v2792_v2 = vld [vmem:[%s4520_s4] ss:$0 sm:$0xff] }
 0xa45   : > { %v2296_v30 = vpop.xlane.xlu0 %2295 }
 0xa46   : > { %v2315_v47 = vmul.f32 0.03125, %v2296_v30  ;;  %v2340_v40 = vsel %vm367_vm0, %v2330_v57, 0.0  ;;  %v2329_v8 = vmul.f32 %v4415_v4, %v4415_v4 }
 0xa47   : > { %2341 = vadd.xlane.f32.xlu0 %v2340_v40 }
 0xa48   : > { %v4422_v19 = vsub.f32 %v2282_v25, %v2315_v47  ;;  %v2337_v31 = vsel %vm367_vm0, %v2329_v8, 0.0 }
 0xa49   : > { %v2302_v23 = vpop.xlane.xlu1 %2301  ;;  %2338 = vadd.xlane.f32.xlu1 %v2337_v31  ;;  %v2299_v26 = vpop.xlane.xlu0 %2298 }
 0xa4a   : > { %v2317_v54 = vmul.f32 0.03125, %v2302_v23  ;;  %v2316_v50 = vmul.f32 0.03125, %v2299_v26  ;;  %v2331_v14 = vmul.f32 %v4422_v19, %v4422_v19  ;;  %v2793_v26 = vld [vmem:[%s4521_s5] ss:$0 sm:$0xff] }
 0xa4c   : > { %v4427_v37 = vsub.f32 %v2284_v27, %v2317_v54  ;;  %v4429_v39 = vsub.f32 %v2283_v3, %v2316_v50  ;;  %v2343_v16 = vsel %vm367_vm0, %v2331_v14, 0.0 }
 0xa4d   : > { %v2308_v32 = vpop.xlane.xlu1 %2307  ;;  %2344 = vadd.xlane.f32.xlu1 %v2343_v16  ;;  %v2305_v53 = vpop.xlane.xlu0 %2304 }
 0xa4e   : > { %v2319_v41 = vmul.f32 0.03125, %v2308_v32  ;;  %v2318_v1 = vmul.f32 0.03125, %v2305_v53  ;;  %v2333_v52 = vmul.f32 %v4427_v37, %v4427_v37  ;;  %v2332_v20 = vmul.f32 %v4429_v39, %v4429_v39 }
 0xa50   : > { %v4436_v5 = vsub.f32 %v2286_v10, %v2319_v41  ;;  %v4438_v58 = vsub.f32 %v2285_v61, %v2318_v1  ;;  %v2349_v55 = vsel %vm367_vm0, %v2333_v52, 0.0  ;;  %v2346_v18 = vsel %vm367_vm0, %v2332_v20, 0.0 }
 0xa51   : > { %2350 = vadd.xlane.f32.xlu1 %v2349_v55  ;;  %2347 = vadd.xlane.f32.xlu0 %v2346_v18  ;;  %v2311_v25 = vpop.xlane.xlu0 %2310 }
 0xa52   : > { %v2320_v45 = vmul.f32 0.03125, %v2311_v25  ;;  %v2335_v6 = vmul.f32 %v4436_v5, %v4436_v5  ;;  %v2334_v51 = vmul.f32 %v4438_v58, %v4438_v58 }
 0xa54   : > { %v4446_v0 = vsub.f32 %v2287_v62, %v2320_v45  ;;  %v2355_v15 = vsel %vm367_vm0, %v2335_v6, 0.0  ;;  %v2352_v17 = vsel %vm367_vm0, %v2334_v51, 0.0 }
 0xa55   : > { %2356 = vadd.xlane.f32.xlu1 %v2355_v15  ;;  %2353 = vadd.xlane.f32.xlu0 %v2352_v17 }
 0xa56   : > { %v2336_v28 = vmul.f32 %v4446_v0, %v4446_v0 }
 0xa58   : > { %v2358_v3 = vsel %vm367_vm0, %v2336_v28, 0.0 }
 0xa59   : > { %2359 = vadd.xlane.f32.xlu0 %v2358_v3 }
 0xad0   : > { %v2342_v9 = vpop.xlane.xlu0 %2341 }
 0xad1   : > { %v2362_v24 = vmul.f32 0.03125, %v2342_v9 }
 0xad2   : > { %v2339_v27 = vpop.xlane.xlu1 %2338 }
 0xad3   : > { %v2370_v43 = vadd.f32 1e-05, %v2362_v24  ;;  %v2361_v46 = vmul.f32 0.03125, %v2339_v27 }
 0xad5   : > { %3424 = vrsqrt.f32 %v2370_v43  ;;  %v2369_v60 = vadd.f32 1e-05, %v2361_v46 }
 0xad6   : > { %v2345_v21 = vpop.xlane.xlu1 %2344 }
 0xad7   : > { %3426 = vrsqrt.f32 %v2369_v60  ;;  %v2363_v29 = vmul.f32 0.03125, %v2345_v21 }
 0xad9   : > { %v2371_v12 = vadd.f32 1e-05, %v2363_v29 }
 0xada   : > { %v2351_v61 = vpop.xlane.xlu1 %2350  ;;  %v2348_v56 = vpop.xlane.xlu0 %2347 }
 0xadb   : > { %3428 = vrsqrt.f32 %v2371_v12  ;;  %v2365_v22 = vmul.f32 0.03125, %v2351_v61  ;;  %v2364_v59 = vmul.f32 0.03125, %v2348_v56 }
 0xadd   : > { %v2373_v33 = vadd.f32 1e-05, %v2365_v22  ;;  %v2372_v10 = vadd.f32 1e-05, %v2364_v59 }
 0xade   : > { %v2357_v49 = vpop.xlane.xlu1 %2356  ;;  %v2354_v13 = vpop.xlane.xlu0 %2353 }
 0xadf   : > { %3430 = vrsqrt.f32 %v2373_v33  ;;  %v2367_v36 = vmul.f32 0.03125, %v2357_v49  ;;  %v2366_v62 = vmul.f32 0.03125, %v2354_v13 }
 0xae0   : > { %3432 = vrsqrt.f32 %v2372_v10 }
 0xae1   : > { %v2375_v44 = vadd.f32 1e-05, %v2367_v36  ;;  %v2374_v38 = vadd.f32 1e-05, %v2366_v62 }
 0xae2   : > { %v3425_v63 = vpop.eup %3424  ;;  %v2360_v11 = vpop.xlane.xlu0 %2359 }
 0xae3   : > { %v2386_v57 = vmul.f32 %v3425_v63, %v4413_v7  ;;  %3434 = vrsqrt.f32 %v2375_v44  ;;  %v2368_v30 = vmul.f32 0.03125, %v2360_v11 }
 0xae4   : > { %v3427_v47 = vpop.eup %3426  ;;  %3436 = vrsqrt.f32 %v2374_v38 }
 0xae5   : > { %v2376_v40 = vadd.f32 1e-05, %v2368_v30  ;;  %v2385_v8 = vmul.f32 %v3427_v47, %v4415_v4  ;;  %v2401_v31 = vmul.f32 %v2792_v2, %v2386_v57 }
 0xae7   : > { %3438 = vrsqrt.f32 %v2376_v40  ;;  %v2400_v23 = vmul.f32 %v2792_v2, %v2385_v8  ;;  %v2416_v16 = vadd.f32 %v2793_v26, %v2401_v31 }
 0xae8   : > { %v3429_v54 = vpop.eup %3428 }
 0xae9   : > { %v2415_v50 = vadd.f32 %v2793_v26, %v2400_v23  ;;  %v2387_v14 = vmul.f32 %v3429_v54, %v4422_v19 }
 0xaeb   : > { %3213 = vmatprep.mubr.msk.f32.mxu1 %vm367_vm0, %v2415_v50  ;;  %v2402_v7 = vmul.f32 %v2792_v2, %v2387_v14 }
 0xaec   : > { %v3431_v32 = vpop.eup %3430  ;;  %3214 = vmatmul.mubr.msk.f32.vlgmr.msra.gmra.mxu1 %vm367_vm0, %v2416_v16 }
 0xaed   : > { %v3433_v53 = vpop.eup %3432  ;;  %v2417_v4 = vadd.f32 %v2793_v26, %v2402_v7  ;;  %v2389_v41 = vmul.f32 %v3431_v32, %v4427_v37 }
 0xaee   : > { %v2388_v1 = vmul.f32 %v3433_v53, %v4429_v39 }
 0xaef   : > { %3216 = vmatprep.mubr.msk.f32.mxu1 %vm367_vm0, %v2417_v4  ;;  %v2404_v52 = vmul.f32 %v2792_v2, %v2389_v41 }
 0xaf0   : > { %v3435_v20 = vpop.eup %3434  ;;  %v2403_v55 = vmul.f32 %v2792_v2, %v2388_v1 }
 0xaf1   : > { %v3437_v18 = vpop.eup %3436  ;;  %v2419_v19 = vadd.f32 %v2793_v26, %v2404_v52  ;;  %v2391_v25 = vmul.f32 %v3435_v20, %v4436_v5 }
 0xaf2   : > { %v2418_v45 = vadd.f32 %v2793_v26, %v2403_v55  ;;  %v2390_v6 = vmul.f32 %v3437_v18, %v4438_v58  ;;  %v2794_v58 = vld [vmem:[%s4523_s7] ss:$0 sm:$0xff] }
 0xaf3   : > { %v2406_v51 = vmul.f32 %v2792_v2, %v2391_v25 }
 0xaf4   : > { %v3439_v15 = vpop.eup %3438  ;;  %3217 = vmatmul.mubr.msk.f32.gmra.mxu1 %vm367_vm0, %v2418_v45  ;;  %v2405_v37 = vmul.f32 %v2792_v2, %v2390_v6 }
 0xaf5   : > { %3219 = vmatprep.mubr.msk.f32.mxu1 %vm367_vm0, %v2419_v19  ;;  %v2421_v39 = vadd.f32 %v2793_v26, %v2406_v51  ;;  %v2392_v17 = vmul.f32 %v3439_v15, %v4446_v0 }
 0xaf6   : > { %v2420_v28 = vadd.f32 %v2793_v26, %v2405_v37 }
 0xaf7   : > { %v2407_v3 = vmul.f32 %v2792_v2, %v2392_v17 }
 0xaf8   : > { %3220 = vmatmul.mubr.msk.f32.gmra.mxu1 %vm367_vm0, %v2420_v28 }
 0xaf9   : > { %3222 = vmatprep.mubr.msk.f32.mxu1 %vm367_vm0, %v2421_v39  ;;  %v2422_v5 = vadd.f32 %v2793_v26, %v2407_v3 }
 0xafc   : > { %3223 = vmatmul.mubr.msk.f32.gmra.mxu1 %vm367_vm0, %v2422_v5 }
 0xbac   : > { %v3215_v34 = vpop.f32.mrf.mxu1 }
 0xbad   : > { %v2530_v0 = vadd.f32 %v3215_v34, %v2794_v58 }
 0xbae   : > { %v2524_v35 = vpop.f32.mrf.mxu1 }
 0xbaf   : > { %2564 = vst.msk [vmem:[%s347_s25 + $0x8] sm:$0xff] %vm367_vm0, %v2530_v0  ;;  %v2525_v42 = vadd.f32 %v2794_v58, %v2524_v35 }
 0xbb1   : > { %2563 = vst.msk [vmem:[%s347_s25] sm:$0xff] %vm367_vm0, %v2525_v42 }
 0xbb4   : > { %v3218_v48 = vpop.f32.mrf.mxu1 }
 0xbb5   : > { %v2540_v9 = vadd.f32 %v3218_v48, %v2794_v58 }
 0xbb6   : > { %v2534_v24 = vpop.f32.mrf.mxu1 }
 0xbb7   : > { %2566 = vst.msk [vmem:[%s347_s25 + $0x18] sm:$0xff] %vm367_vm0, %v2540_v9  ;;  %v2535_v27 = vadd.f32 %v2794_v58, %v2534_v24 }
 0xbb8   : > { %v3221_v43 = vpop.f32.mrf.mxu1 }
 0xbb9   : > { %2565 = vst.msk [vmem:[%s347_s25 + $0x10] sm:$0xff] %vm367_vm0, %v2535_v27  ;;  %v2550_v46 = vadd.f32 %v3221_v43, %v2794_v58 }
 0xbba   : > { %v2544_v60 = vpop.f32.mrf.mxu1 }
 0xbbb   : > { %2568 = vst.msk [vmem:[%s347_s25 + $0x28] sm:$0xff] %vm367_vm0, %v2550_v46  ;;  %v2545_v21 = vadd.f32 %v2794_v58, %v2544_v60 }
 0xbbc   : > { %v3224_v29 = vpop.f32.mrf.mxu1 }
 0xbbd   : > { %2567 = vst.msk [vmem:[%s347_s25 + $0x20] sm:$0xff] %vm367_vm0, %v2545_v21  ;;  %v2560_v12 = vadd.f32 %v3224_v29, %v2794_v58 }
 0xbbe   : > { %v2554_v61 = vpop.f32.mrf.mxu1 }
 0xbbf   : > { %2570 = vst.msk [vmem:[%s347_s25 + $0x38] sm:$0xff] %vm367_vm0, %v2560_v12  ;;  %v2555_v56 = vadd.f32 %v2794_v58, %v2554_v61 }
 0xbc1   : > { %2569 = vst.msk [vmem:[%s347_s25 + $0x30] sm:$0xff] %vm367_vm0, %v2555_v56 }
 0xbc2 PF: > { %p18_p8 = scmp.ge.s32.totalorder %s3588_s10, 4   ;;  %s4538_s27 = smov %s3494_s28 }
 0xbc3   : > { %s4539_s28 = smov %s3498_s29  ;;  %s4540_s29 = smov %s3598_s13 }
 0xbc4   : > { %s4541_s30 = smov %s3588_s10  ;;  %20 = sbr.rel (!%p18_p8) target bundleno = 3 (0x3), region = 98 }
 0xbc9   :  { %2592 = vsyncpa [#allocation3], 1 }
 0xbca   :  { %2594 = vsyncpa [#allocation3 + $0x1], 1 }

</bundles_post_ra>
